<compile_context>
chip_gen: v5e
topology: v5e:2x2
jax: 0.10.0
libtpu: 0.0.40
codegen_flags: <defaults>
</compile_context>

<pallas_src>
import functools

import jax
import jax.numpy as jnp
from jax import lax
from jax.experimental import pallas as pl
from jax.experimental.pallas import tpu as pltpu

EPS = 1e-5


# ----------------------------- Pallas kernel --------------------------------

def _conv3x3_kernel(*refs, stride, Ho, Wo, shortcut):
    """Direct 3x3 conv (padding already applied) for ONE image + optional shortcut.

    refs (in order):
      h_ref  : (1, s*s, Hq, Wq, Cin) bf16  parity-split, zero-padded relu(bn(x))
      w_ref  : (9, Cin, Cout)        bf16  conv weights, tap-major (kh*3+kw)
      sc_ref : (1, Ho, Wo, Csc)            shortcut input (f32 identity / bf16 proj)
      wsc_ref: (Csc, Cout)           bf16  1x1 projection weights (proj only)
      o_ref  : (1, Ho*Wo, Cout)            output tile
    """
    if shortcut == "proj":
        h_ref, w_ref, sc_ref, wsc_ref, o_ref = refs
    elif shortcut == "identity":
        h_ref, w_ref, sc_ref, o_ref = refs
    else:
        h_ref, w_ref, o_ref = refs

    s = stride
    M = Ho * Wo
    cin = h_ref.shape[-1]
    cout = w_ref.shape[-1]

    # Shortcut initializes the f32 accumulator (exact f32 add for identity,
    # separate small MXU dot for the 1x1 projection).
    if shortcut == "proj":
        acc = jnp.dot(sc_ref[0].reshape(M, sc_ref.shape[-1]), wsc_ref[...],
                      preferred_element_type=jnp.float32)
    elif shortcut == "identity":
        acc = sc_ref[0].reshape(M, cout)           # already f32
    else:
        acc = jnp.zeros((M, cout), jnp.float32)

    # 9 taps formed in VMEM as unstrided slices of the parity-split activation:
    # output pixel (ho, wo) needs hpad[s*ho+kh, s*wo+kw, :]
    #   = parity[(kh%s)*s + (kw%s)][ho + kh//s, wo + kw//s, :]
    for kh in range(3):
        for kw in range(3):
            tap = h_ref[0, (kh % s) * s + (kw % s),
                        pl.ds(kh // s, Ho), pl.ds(kw // s, Wo), :]
            acc = acc + jnp.dot(tap.reshape(M, cin), w_ref[kh * 3 + kw],
                                preferred_element_type=jnp.float32)

    o_ref[0] = acc.astype(o_ref.dtype)


def _conv3x3(h_parity, w_taps, *, stride, Ho, Wo, out_dtype,
             shortcut=None, sc=None, w_sc=None):
    """pallas_call wrapper: grid over batch, per-image direct conv + shortcut."""
    N = h_parity.shape[0]
    cout = w_taps.shape[-1]

    kern = functools.partial(_conv3x3_kernel, stride=stride, Ho=Ho, Wo=Wo,
                             shortcut=shortcut)

    in_specs = [
        # Per-image padded activation tile (pipelined across the batch grid).
        pl.BlockSpec((1,) + h_parity.shape[1:], lambda n: (n, 0, 0, 0, 0)),
        # Weights: grid-invariant, fully resident.
        # NOTE(v7x): add pipeline_mode=pl.Buffered(1) here to single-buffer.
        pl.BlockSpec(w_taps.shape, lambda n: (0, 0, 0)),
    ]
    args = [h_parity, w_taps]
    if shortcut is not None:
        in_specs.append(pl.BlockSpec((1,) + sc.shape[1:], lambda n: (n, 0, 0, 0)))
        args.append(sc)
    if shortcut == "proj":
        in_specs.append(pl.BlockSpec(w_sc.shape, lambda n: (0, 0)))
        args.append(w_sc)

    out = pl.pallas_call(
        kern,
        out_shape=jax.ShapeDtypeStruct((N, Ho * Wo, cout), out_dtype),
        grid=(N,),
        in_specs=in_specs,
        out_specs=pl.BlockSpec((1, Ho * Wo, cout), lambda n: (n, 0, 0)),
        compiler_params=pltpu.CompilerParams(
            dimension_semantics=("parallel",),          # shard batch over TCs (v7x)
            vmem_limit_bytes=64 * 1024 * 1024),         # roomy on v5e/v6e, <= v7x physical
    )(*args)
    return out


# ------------------------------ JAX glue -------------------------------------

def _bn_relu_nhwc(x, gamma, beta, mean, var):
    """Eval-mode BN + ReLU as one fused XLA elementwise pass (per-channel, NHWC)."""
    inv = gamma * lax.rsqrt(var + EPS)
    return jax.nn.relu(x * inv + (beta - mean * inv))


def _pad_and_parity(h, stride):
    """Zero-pad by 1 and split into stride*stride parity sub-images.

    (N, H, W, C) -> (N, s*s, Hq, Wq, C) with P[:, pr*s+pc] = hpad[:, pr::s, pc::s].
    For s=1 this is just the padded activation with a unit parity axis.
    One activation-sized pass in XLA (no 9x patch expansion).
    """
    N, H, W, C = h.shape
    s = stride
    hp = jnp.pad(h, ((0, 0), (1, 1), (1, 1), (0, 0)))
    Hp, Wp = H + 2, W + 2
    Hq = -(-Hp // s)
    Wq = -(-Wp // s)
    hp = jnp.pad(hp, ((0, 0), (0, Hq * s - Hp), (0, Wq * s - Wp), (0, 0)))
    p = hp.reshape(N, Hq, s, Wq, s, C).transpose(0, 2, 4, 1, 3, 5)
    return p.reshape(N, s * s, Hq, Wq, C)


def _w3x3_to_taps(w_oihw):
    """(Cout, Cin, 3, 3) -> (9, Cin, Cout), tap index = kh*3 + kw."""
    cout, cin = w_oihw.shape[0], w_oihw.shape[1]
    return jnp.transpose(w_oihw, (2, 3, 1, 0)).reshape(9, cin, cout)


@functools.partial(jax.jit, static_argnames=("stride",))
def basic_block_pallas(x_nchw, params, stride):
    N, Cin, H, W = x_nchw.shape
    x = jnp.transpose(x_nchw, (0, 2, 3, 1)).astype(jnp.float32)   # NHWC
    Ho = (H - 1) // stride + 1
    Wo = (W - 1) // stride + 1
    Cout = params["w1"].shape[0]

    # --- relu(bn1(x)) in XLA, conv1 in Pallas (patches formed in VMEM) -------
    h1 = _bn_relu_nhwc(x, *params["bn1"])
    h1p = _pad_and_parity(h1.astype(jnp.bfloat16), stride)
    w1 = _w3x3_to_taps(params["w1"]).astype(jnp.bfloat16)

    y1 = _conv3x3(h1p, w1, stride=stride, Ho=Ho, Wo=Wo,
                  out_dtype=jnp.bfloat16)                         # bf16 writeback

    # dropout: identity in eval mode.
    # TODO(synk): training-mode dropout (Bernoulli mask + 1/(1-p) scaling) not implemented.

    # --- relu(bn2(y1)) in XLA, conv2 + shortcut fused in one Pallas call -----
    y1 = y1.reshape(N, Ho, Wo, Cout)
    h2 = _bn_relu_nhwc(y1.astype(jnp.float32), *params["bn2"])
    h2p = _pad_and_parity(h2.astype(jnp.bfloat16), 1)
    w2 = _w3x3_to_taps(params["w2"]).astype(jnp.bfloat16)

    if "ws" in params:   # projection shortcut: 1x1 conv, stride `stride`, no pad
        sc = x[:, ::stride, ::stride, :].astype(jnp.bfloat16)     # (N, Ho, Wo, Cin)
        w_sc = jnp.transpose(params["ws"], (2, 3, 1, 0)).reshape(Cin, Cout)
        out = _conv3x3(h2p, w2, stride=1, Ho=Ho, Wo=Wo, out_dtype=jnp.float32,
                       shortcut="proj", sc=sc, w_sc=w_sc.astype(jnp.bfloat16))
    else:                # identity shortcut: exact f32 residual add on the VPU
        assert stride == 1 and Cin == Cout
        out = _conv3x3(h2p, w2, stride=1, Ho=Ho, Wo=Wo, out_dtype=jnp.float32,
                       shortcut="identity", sc=x)

    out = out.reshape(N, Ho, Wo, Cout)
    return jnp.transpose(out, (0, 3, 1, 2))                       # back to NCHW


# -------------------------- pure-JAX reference -------------------------------

def _ref_bn(x, gamma, beta, mean, var):
    inv = gamma / jnp.sqrt(var + EPS)
    return (x - mean[None, :, None, None]) * inv[None, :, None, None] \
        + beta[None, :, None, None]


def ref_forward(x, params, stride):
    dn = ("NCHW", "OIHW", "NCHW")
    h = jax.nn.relu(_ref_bn(x, *params["bn1"]))
    y = lax.conv_general_dilated(h, params["w1"], (stride, stride),
                                 ((1, 1), (1, 1)), dimension_numbers=dn,
                                 precision=lax.Precision.HIGHEST)
    h2 = jax.nn.relu(_ref_bn(y, *params["bn2"]))
    y2 = lax.conv_general_dilated(h2, params["w2"], (1, 1),
                                  ((1, 1), (1, 1)), dimension_numbers=dn,
                                  precision=lax.Precision.HIGHEST)
    if "ws" in params:
        sc = lax.conv_general_dilated(x, params["ws"], (stride, stride),
                                      ((0, 0), (0, 0)), dimension_numbers=dn,
                                      precision=lax.Precision.HIGHEST)
    else:
        sc = x
    return y2 + sc


# ---------------------------- parameter init ---------------------------------

def init_params(key, in_planes, out_planes, stride):
    ks = jax.random.split(key, 12)
    f32 = jnp.float32
    params = {
        "w1": 0.1 * jax.random.normal(ks[0], (out_planes, in_planes, 3, 3), f32),
        "w2": 0.1 * jax.random.normal(ks[1], (out_planes, out_planes, 3, 3), f32),
        "bn1": (1.0 + 0.1 * jax.random.normal(ks[2], (in_planes,), f32),   # gamma
                0.1 * jax.random.normal(ks[3], (in_planes,), f32),         # beta
                0.1 * jax.random.normal(ks[4], (in_planes,), f32),         # running_mean
                jax.random.uniform(ks[5], (in_planes,), f32, 0.5, 1.5)),   # running_var
        "bn2": (1.0 + 0.1 * jax.random.normal(ks[6], (out_planes,), f32),
                0.1 * jax.random.normal(ks[7], (out_planes,), f32),
                0.1 * jax.random.normal(ks[8], (out_planes,), f32),
                jax.random.uniform(ks[9], (out_planes,), f32, 0.5, 1.5)),
    }
    if stride != 1 or in_planes != out_planes:
        params["ws"] = 0.1 * jax.random.normal(ks[10], (out_planes, in_planes, 1, 1), f32)
    return params


# --------------------------------- main ---------------------------------------

if __name__ == "__main__":
    key = jax.random.PRNGKey(0)
    kx, kp1, kp2 = jax.random.split(key, 3)

    # bf16 MXU conv inputs with f32 accumulation -> bf16-appropriate tolerance.
    RTOL = ATOL = 2e-2

    # Config A: projection shortcut (stride 2, 4 -> 8 channels)
    N, Cin, H, W = 2, 4, 16, 16
    x = jax.random.normal(kx, (N, Cin, H, W), jnp.float32)

    params_a = init_params(kp1, in_planes=4, out_planes=8, stride=2)
    out_a = basic_block_pallas(x, params_a, stride=2)
    out_a = jax.block_until_ready(out_a)
    ref_a = ref_forward(x, params_a, 2)
    assert out_a.shape == (N, 8, H // 2, W // 2), out_a.shape
    assert jnp.allclose(out_a, ref_a, rtol=RTOL, atol=ATOL), \
        float(jnp.max(jnp.abs(out_a - ref_a)))

    # Config B: identity shortcut (stride 1, 4 -> 4 channels)
    params_b = init_params(kp2, in_planes=4, out_planes=4, stride=1)
    out_b = basic_block_pallas(x, params_b, stride=1)
    out_b = jax.block_until_ready(out_b)
    ref_b = ref_forward(x, params_b, 1)
    assert out_b.shape == (N, 4, H, W), out_b.shape
    assert jnp.allclose(out_b, ref_b, rtol=RTOL, atol=ATOL), \
        float(jnp.max(jnp.abs(out_b - ref_b)))

    print("KERNEL_OK")
</pallas_src>

<mosaic_0001>
module attributes {stable_mosaic.version = 11 : i64} {
  func.func @_conv3x3_kernel(%arg0: i32, %arg1: memref<1x4x9x9x4xbf16, #tpu.memory_space<vmem>>, %arg2: memref<9x4x8xbf16, #tpu.memory_space<vmem>>, %arg3: memref<1x64x8xbf16, #tpu.memory_space<vmem>>) attributes {dimension_semantics = [#tpu.dimension_semantics<parallel>], iteration_bounds = array<i64: 2>, scalar_prefetch = 0 : i64, scratch_operands = 0 : i64, tpu.core_type = #tpu.core_type<tc>, window_params = [{transform_indices = @transform_0, window_bounds = array<i64: 1, 4, 9, 9, 4>}, {pipeline_mode = #tpu.pipeline_mode<synchronous>, transform_indices = @transform_1, window_bounds = array<i64: 9, 4, 8>}, {transform_indices = @transform_2, window_bounds = array<i64: 1, 64, 8>}]} {
    %cst = arith.constant 0.000000e+00 : f32
    %0 = vector.broadcast %cst : f32 to vector<64x8xf32>
    %c0 = arith.constant 0 : index
    %c0_0 = arith.constant 0 : index
    %c0_1 = arith.constant 0 : index
    %c0_2 = arith.constant 0 : index
    %c0_3 = arith.constant 0 : index
    %1 = vector.load %arg1[%c0, %c0_0, %c0_1, %c0_2, %c0_3] : memref<1x4x9x9x4xbf16, #tpu.memory_space<vmem>>, vector<1x1x8x8x4xbf16>
    %2 = vector.shape_cast %1 : vector<1x1x8x8x4xbf16> to vector<8x8x4xbf16>
    %3 = vector.shape_cast %2 : vector<8x8x4xbf16> to vector<64x4xbf16>
    %c0_4 = arith.constant 0 : index
    %c0_5 = arith.constant 0 : index
    %c0_6 = arith.constant 0 : index
    %4 = vector.load %arg2[%c0_4, %c0_5, %c0_6] : memref<9x4x8xbf16, #tpu.memory_space<vmem>>, vector<1x4x8xbf16>
    %5 = vector.shape_cast %4 : vector<1x4x8xbf16> to vector<4x8xbf16>
    %cst_7 = arith.constant dense<0.000000e+00> : vector<64x8xf32>
    %6 = tpu.matmul %3, %5, %cst_7 {dimension_numbers = #tpu.dot_dimension_numbers<[1], [0], [0], [1], [0, 0, 1, 1], [], []>} : vector<64x4xbf16>, vector<4x8xbf16>, vector<64x8xf32> -> vector<64x8xf32>
    %7 = arith.addf %0, %6 : vector<64x8xf32>
    %c0_8 = arith.constant 0 : index
    %c1 = arith.constant 1 : index
    %c0_9 = arith.constant 0 : index
    %c0_10 = arith.constant 0 : index
    %c0_11 = arith.constant 0 : index
    %8 = vector.load %arg1[%c0_8, %c1, %c0_9, %c0_10, %c0_11] : memref<1x4x9x9x4xbf16, #tpu.memory_space<vmem>>, vector<1x1x8x8x4xbf16>
    %9 = vector.shape_cast %8 : vector<1x1x8x8x4xbf16> to vector<8x8x4xbf16>
    %10 = vector.shape_cast %9 : vector<8x8x4xbf16> to vector<64x4xbf16>
    %c1_12 = arith.constant 1 : index
    %c0_13 = arith.constant 0 : index
    %c0_14 = arith.constant 0 : index
    %11 = vector.load %arg2[%c1_12, %c0_13, %c0_14] : memref<9x4x8xbf16, #tpu.memory_space<vmem>>, vector<1x4x8xbf16>
    %12 = vector.shape_cast %11 : vector<1x4x8xbf16> to vector<4x8xbf16>
    %cst_15 = arith.constant dense<0.000000e+00> : vector<64x8xf32>
    %13 = tpu.matmul %10, %12, %cst_15 {dimension_numbers = #tpu.dot_dimension_numbers<[1], [0], [0], [1], [0, 0, 1, 1], [], []>} : vector<64x4xbf16>, vector<4x8xbf16>, vector<64x8xf32> -> vector<64x8xf32>
    %14 = arith.addf %7, %13 : vector<64x8xf32>
    %c0_16 = arith.constant 0 : index
    %c0_17 = arith.constant 0 : index
    %c0_18 = arith.constant 0 : index
    %c1_19 = arith.constant 1 : index
    %c0_20 = arith.constant 0 : index
    %15 = vector.load %arg1[%c0_16, %c0_17, %c0_18, %c1_19, %c0_20] : memref<1x4x9x9x4xbf16, #tpu.memory_space<vmem>>, vector<1x1x8x8x4xbf16>
    %16 = vector.shape_cast %15 : vector<1x1x8x8x4xbf16> to vector<8x8x4xbf16>
    %17 = vector.shape_cast %16 : vector<8x8x4xbf16> to vector<64x4xbf16>
    %c2 = arith.constant 2 : index
    %c0_21 = arith.constant 0 : index
    %c0_22 = arith.constant 0 : index
    %18 = vector.load %arg2[%c2, %c0_21, %c0_22] : memref<9x4x8xbf16, #tpu.memory_space<vmem>>, vector<1x4x8xbf16>
    %19 = vector.shape_cast %18 : vector<1x4x8xbf16> to vector<4x8xbf16>
    %cst_23 = arith.constant dense<0.000000e+00> : vector<64x8xf32>
    %20 = tpu.matmul %17, %19, %cst_23 {dimension_numbers = #tpu.dot_dimension_numbers<[1], [0], [0], [1], [0, 0, 1, 1], [], []>} : vector<64x4xbf16>, vector<4x8xbf16>, vector<64x8xf32> -> vector<64x8xf32>
    %21 = arith.addf %14, %20 : vector<64x8xf32>
    %c0_24 = arith.constant 0 : index
    %c2_25 = arith.constant 2 : index
    %c0_26 = arith.constant 0 : index
    %c0_27 = arith.constant 0 : index
    %c0_28 = arith.constant 0 : index
    %22 = vector.load %arg1[%c0_24, %c2_25, %c0_26, %c0_27, %c0_28] : memref<1x4x9x9x4xbf16, #tpu.memory_space<vmem>>, vector<1x1x8x8x4xbf16>
    %23 = vector.shape_cast %22 : vector<1x1x8x8x4xbf16> to vector<8x8x4xbf16>
    %24 = vector.shape_cast %23 : vector<8x8x4xbf16> to vector<64x4xbf16>
    %c3 = arith.constant 3 : index
    %c0_29 = arith.constant 0 : index
    %c0_30 = arith.constant 0 : index
    %25 = vector.load %arg2[%c3, %c0_29, %c0_30] : memref<9x4x8xbf16, #tpu.memory_space<vmem>>, vector<1x4x8xbf16>
    %26 = vector.shape_cast %25 : vector<1x4x8xbf16> to vector<4x8xbf16>
    %cst_31 = arith.constant dense<0.000000e+00> : vector<64x8xf32>
    %27 = tpu.matmul %24, %26, %cst_31 {dimension_numbers = #tpu.dot_dimension_numbers<[1], [0], [0], [1], [0, 0, 1, 1], [], []>} : vector<64x4xbf16>, vector<4x8xbf16>, vector<64x8xf32> -> vector<64x8xf32>
    %28 = arith.addf %21, %27 : vector<64x8xf32>
    %c0_32 = arith.constant 0 : index
    %c3_33 = arith.constant 3 : index
    %c0_34 = arith.constant 0 : index
    %c0_35 = arith.constant 0 : index
    %c0_36 = arith.constant 0 : index
    %29 = vector.load %arg1[%c0_32, %c3_33, %c0_34, %c0_35, %c0_36] : memref<1x4x9x9x4xbf16, #tpu.memory_space<vmem>>, vector<1x1x8x8x4xbf16>
    %30 = vector.shape_cast %29 : vector<1x1x8x8x4xbf16> to vector<8x8x4xbf16>
    %31 = vector.shape_cast %30 : vector<8x8x4xbf16> to vector<64x4xbf16>
    %c4 = arith.constant 4 : index
    %c0_37 = arith.constant 0 : index
    %c0_38 = arith.constant 0 : index
    %32 = vector.load %arg2[%c4, %c0_37, %c0_38] : memref<9x4x8xbf16, #tpu.memory_space<vmem>>, vector<1x4x8xbf16>
    %33 = vector.shape_cast %32 : vector<1x4x8xbf16> to vector<4x8xbf16>
    %cst_39 = arith.constant dense<0.000000e+00> : vector<64x8xf32>
    %34 = tpu.matmul %31, %33, %cst_39 {dimension_numbers = #tpu.dot_dimension_numbers<[1], [0], [0], [1], [0, 0, 1, 1], [], []>} : vector<64x4xbf16>, vector<4x8xbf16>, vector<64x8xf32> -> vector<64x8xf32>
    %35 = arith.addf %28, %34 : vector<64x8xf32>
    %c0_40 = arith.constant 0 : index
    %c2_41 = arith.constant 2 : index
    %c0_42 = arith.constant 0 : index
    %c1_43 = arith.constant 1 : index
    %c0_44 = arith.constant 0 : index
    %36 = vector.load %arg1[%c0_40, %c2_41, %c0_42, %c1_43, %c0_44] : memref<1x4x9x9x4xbf16, #tpu.memory_space<vmem>>, vector<1x1x8x8x4xbf16>
    %37 = vector.shape_cast %36 : vector<1x1x8x8x4xbf16> to vector<8x8x4xbf16>
    %38 = vector.shape_cast %37 : vector<8x8x4xbf16> to vector<64x4xbf16>
    %c5 = arith.constant 5 : index
    %c0_45 = arith.constant 0 : index
    %c0_46 = arith.constant 0 : index
    %39 = vector.load %arg2[%c5, %c0_45, %c0_46] : memref<9x4x8xbf16, #tpu.memory_space<vmem>>, vector<1x4x8xbf16>
    %40 = vector.shape_cast %39 : vector<1x4x8xbf16> to vector<4x8xbf16>
    %cst_47 = arith.constant dense<0.000000e+00> : vector<64x8xf32>
    %41 = tpu.matmul %38, %40, %cst_47 {dimension_numbers = #tpu.dot_dimension_numbers<[1], [0], [0], [1], [0, 0, 1, 1], [], []>} : vector<64x4xbf16>, vector<4x8xbf16>, vector<64x8xf32> -> vector<64x8xf32>
    %42 = arith.addf %35, %41 : vector<64x8xf32>
    %c0_48 = arith.constant 0 : index
    %c0_49 = arith.constant 0 : index
    %c1_50 = arith.constant 1 : index
    %c0_51 = arith.constant 0 : index
    %c0_52 = arith.constant 0 : index
    %43 = vector.load %arg1[%c0_48, %c0_49, %c1_50, %c0_51, %c0_52] : memref<1x4x9x9x4xbf16, #tpu.memory_space<vmem>>, vector<1x1x8x8x4xbf16>
    %44 = vector.shape_cast %43 : vector<1x1x8x8x4xbf16> to vector<8x8x4xbf16>
    %45 = vector.shape_cast %44 : vector<8x8x4xbf16> to vector<64x4xbf16>
    %c6 = arith.constant 6 : index
    %c0_53 = arith.constant 0 : index
    %c0_54 = arith.constant 0 : index
    %46 = vector.load %arg2[%c6, %c0_53, %c0_54] : memref<9x4x8xbf16, #tpu.memory_space<vmem>>, vector<1x4x8xbf16>
    %47 = vector.shape_cast %46 : vector<1x4x8xbf16> to vector<4x8xbf16>
    %cst_55 = arith.constant dense<0.000000e+00> : vector<64x8xf32>
    %48 = tpu.matmul %45, %47, %cst_55 {dimension_numbers = #tpu.dot_dimension_numbers<[1], [0], [0], [1], [0, 0, 1, 1], [], []>} : vector<64x4xbf16>, vector<4x8xbf16>, vector<64x8xf32> -> vector<64x8xf32>
    %49 = arith.addf %42, %48 : vector<64x8xf32>
    %c0_56 = arith.constant 0 : index
    %c1_57 = arith.constant 1 : index
    %c1_58 = arith.constant 1 : index
    %c0_59 = arith.constant 0 : index
    %c0_60 = arith.constant 0 : index
    %50 = vector.load %arg1[%c0_56, %c1_57, %c1_58, %c0_59, %c0_60] : memref<1x4x9x9x4xbf16, #tpu.memory_space<vmem>>, vector<1x1x8x8x4xbf16>
    %51 = vector.shape_cast %50 : vector<1x1x8x8x4xbf16> to vector<8x8x4xbf16>
    %52 = vector.shape_cast %51 : vector<8x8x4xbf16> to vector<64x4xbf16>
    %c7 = arith.constant 7 : index
    %c0_61 = arith.constant 0 : index
    %c0_62 = arith.constant 0 : index
    %53 = vector.load %arg2[%c7, %c0_61, %c0_62] : memref<9x4x8xbf16, #tpu.memory_space<vmem>>, vector<1x4x8xbf16>
    %54 = vector.shape_cast %53 : vector<1x4x8xbf16> to vector<4x8xbf16>
    %cst_63 = arith.constant dense<0.000000e+00> : vector<64x8xf32>
    %55 = tpu.matmul %52, %54, %cst_63 {dimension_numbers = #tpu.dot_dimension_numbers<[1], [0], [0], [1], [0, 0, 1, 1], [], []>} : vector<64x4xbf16>, vector<4x8xbf16>, vector<64x8xf32> -> vector<64x8xf32>
    %56 = arith.addf %49, %55 : vector<64x8xf32>
    %c0_64 = arith.constant 0 : index
    %c0_65 = arith.constant 0 : index
    %c1_66 = arith.constant 1 : index
    %c1_67 = arith.constant 1 : index
    %c0_68 = arith.constant 0 : index
    %57 = vector.load %arg1[%c0_64, %c0_65, %c1_66, %c1_67, %c0_68] : memref<1x4x9x9x4xbf16, #tpu.memory_space<vmem>>, vector<1x1x8x8x4xbf16>
    %58 = vector.shape_cast %57 : vector<1x1x8x8x4xbf16> to vector<8x8x4xbf16>
    %59 = vector.shape_cast %58 : vector<8x8x4xbf16> to vector<64x4xbf16>
    %c8 = arith.constant 8 : index
    %c0_69 = arith.constant 0 : index
    %c0_70 = arith.constant 0 : index
    %60 = vector.load %arg2[%c8, %c0_69, %c0_70] : memref<9x4x8xbf16, #tpu.memory_space<vmem>>, vector<1x4x8xbf16>
    %61 = vector.shape_cast %60 : vector<1x4x8xbf16> to vector<4x8xbf16>
    %cst_71 = arith.constant dense<0.000000e+00> : vector<64x8xf32>
    %62 = tpu.matmul %59, %61, %cst_71 {dimension_numbers = #tpu.dot_dimension_numbers<[1], [0], [0], [1], [0, 0, 1, 1], [], []>} : vector<64x4xbf16>, vector<4x8xbf16>, vector<64x8xf32> -> vector<64x8xf32>
    %63 = arith.addf %56, %62 : vector<64x8xf32>
    %64 = arith.truncf %63 : vector<64x8xf32> to vector<64x8xbf16>
    %c0_72 = arith.constant 0 : index
    %c0_73 = arith.constant 0 : index
    %c0_74 = arith.constant 0 : index
    %65 = vector.load %arg3[%c0_72, %c0_73, %c0_74] : memref<1x64x8xbf16, #tpu.memory_space<vmem>>, vector<1x64x8xbf16>
    %66 = vector.shape_cast %65 : vector<1x64x8xbf16> to vector<64x8xbf16>
    %67 = vector.shape_cast %64 : vector<64x8xbf16> to vector<1x64x8xbf16>
    tpu.vector_store %arg3[%c0_72, %c0_73, %c0_74], %67 {strides = array<i32>} : memref<1x64x8xbf16, #tpu.memory_space<vmem>>, vector<1x64x8xbf16>,
    return
  }
  func.func @transform_0(%arg0: i32) -> (i32, i32, i32, i32, i32) {
    %c0_i32 = arith.constant 0 : i32
    %c0_i32_0 = arith.constant 0 : i32
    %c0_i32_1 = arith.constant 0 : i32
    %c0_i32_2 = arith.constant 0 : i32
    %c0_i32_3 = arith.constant 0 : i32
    return %arg0, %c0_i32, %c0_i32_0, %c0_i32_1, %c0_i32_2 : i32, i32, i32, i32, i32
  }
  func.func @transform_1(%arg0: i32) -> (i32, i32, i32) {
    %c0_i32 = arith.constant 0 : i32
    %c0_i32_0 = arith.constant 0 : i32
    %c0_i32_1 = arith.constant 0 : i32
    %c0_i32_2 = arith.constant 0 : i32
    return %c0_i32, %c0_i32_0, %c0_i32_1 : i32, i32, i32
  }
  func.func @transform_2(%arg0: i32) -> (i32, i32, i32) {
    %c0_i32 = arith.constant 0 : i32
    %c0_i32_0 = arith.constant 0 : i32
    %c0_i32_1 = arith.constant 0 : i32
    return %arg0, %c0_i32, %c0_i32_0 : i32, i32, i32
  }
}

module attributes {stable_mosaic.version = 11 : i64} {
  func.func @_conv3x3_kernel(%arg0: i32, %arg1: memref<1x1x10x10x8xbf16, #tpu.memory_space<vmem>>, %arg2: memref<9x8x8xbf16, #tpu.memory_space<vmem>>, %arg3: memref<1x8x8x4xbf16, #tpu.memory_space<vmem>>, %arg4: memref<4x8xbf16, #tpu.memory_space<vmem>>, %arg5: memref<1x64x8xf32, #tpu.memory_space<vmem>>) attributes {dimension_semantics = [#tpu.dimension_semantics<parallel>], iteration_bounds = array<i64: 2>, scalar_prefetch = 0 : i64, scratch_operands = 0 : i64, tpu.core_type = #tpu.core_type<tc>, window_params = [{transform_indices = @transform_0, window_bounds = array<i64: 1, 1, 10, 10, 8>}, {pipeline_mode = #tpu.pipeline_mode<synchronous>, transform_indices = @transform_1, window_bounds = array<i64: 9, 8, 8>}, {transform_indices = @transform_2, window_bounds = array<i64: 1, 8, 8, 4>}, {pipeline_mode = #tpu.pipeline_mode<synchronous>, transform_indices = @transform_3, window_bounds = array<i64: 4, 8>}, {transform_indices = @transform_4, window_bounds = array<i64: 1, 64, 8>}]} {
    %c0 = arith.constant 0 : index
    %c0_0 = arith.constant 0 : index
    %c0_1 = arith.constant 0 : index
    %c0_2 = arith.constant 0 : index
    %0 = vector.load %arg3[%c0, %c0_0, %c0_1, %c0_2] : memref<1x8x8x4xbf16, #tpu.memory_space<vmem>>, vector<1x8x8x4xbf16>
    %1 = vector.shape_cast %0 : vector<1x8x8x4xbf16> to vector<8x8x4xbf16>
    %2 = vector.shape_cast %1 : vector<8x8x4xbf16> to vector<64x4xbf16>
    %c0_3 = arith.constant 0 : index
    %c0_4 = arith.constant 0 : index
    %3 = vector.load %arg4[%c0_3, %c0_4] : memref<4x8xbf16, #tpu.memory_space<vmem>>, vector<4x8xbf16>
    %cst = arith.constant dense<0.000000e+00> : vector<64x8xf32>
    %4 = tpu.matmul %2, %3, %cst {dimension_numbers = #tpu.dot_dimension_numbers<[1], [0], [0], [1], [0, 0, 1, 1], [], []>} : vector<64x4xbf16>, vector<4x8xbf16>, vector<64x8xf32> -> vector<64x8xf32>
    %c0_5 = arith.constant 0 : index
    %c0_6 = arith.constant 0 : index
    %c0_7 = arith.constant 0 : index
    %c0_8 = arith.constant 0 : index
    %c0_9 = arith.constant 0 : index
    %5 = vector.load %arg1[%c0_5, %c0_6, %c0_7, %c0_8, %c0_9] : memref<1x1x10x10x8xbf16, #tpu.memory_space<vmem>>, vector<1x1x8x8x8xbf16>
    %6 = vector.shape_cast %5 : vector<1x1x8x8x8xbf16> to vector<8x8x8xbf16>
    %7 = vector.shape_cast %6 : vector<8x8x8xbf16> to vector<64x8xbf16>
    %c0_10 = arith.constant 0 : index
    %c0_11 = arith.constant 0 : index
    %c0_12 = arith.constant 0 : index
    %8 = vector.load %arg2[%c0_10, %c0_11, %c0_12] : memref<9x8x8xbf16, #tpu.memory_space<vmem>>, vector<1x8x8xbf16>
    %9 = vector.shape_cast %8 : vector<1x8x8xbf16> to vector<8x8xbf16>
    %cst_13 = arith.constant dense<0.000000e+00> : vector<64x8xf32>
    %10 = tpu.matmul %7, %9, %cst_13 {dimension_numbers = #tpu.dot_dimension_numbers<[1], [0], [0], [1], [0, 0, 1, 1], [], []>} : vector<64x8xbf16>, vector<8x8xbf16>, vector<64x8xf32> -> vector<64x8xf32>
    %11 = arith.addf %4, %10 : vector<64x8xf32>
    %c0_14 = arith.constant 0 : index
    %c0_15 = arith.constant 0 : index
    %c0_16 = arith.constant 0 : index
    %c1 = arith.constant 1 : index
    %c0_17 = arith.constant 0 : index
    %12 = vector.load %arg1[%c0_14, %c0_15, %c0_16, %c1, %c0_17] : memref<1x1x10x10x8xbf16, #tpu.memory_space<vmem>>, vector<1x1x8x8x8xbf16>
    %13 = vector.shape_cast %12 : vector<1x1x8x8x8xbf16> to vector<8x8x8xbf16>
    %14 = vector.shape_cast %13 : vector<8x8x8xbf16> to vector<64x8xbf16>
    %c1_18 = arith.constant 1 : index
    %c0_19 = arith.constant 0 : index
    %c0_20 = arith.constant 0 : index
    %15 = vector.load %arg2[%c1_18, %c0_19, %c0_20] : memref<9x8x8xbf16, #tpu.memory_space<vmem>>, vector<1x8x8xbf16>
    %16 = vector.shape_cast %15 : vector<1x8x8xbf16> to vector<8x8xbf16>
    %cst_21 = arith.constant dense<0.000000e+00> : vector<64x8xf32>
    %17 = tpu.matmul %14, %16, %cst_21 {dimension_numbers = #tpu.dot_dimension_numbers<[1], [0], [0], [1], [0, 0, 1, 1], [], []>} : vector<64x8xbf16>, vector<8x8xbf16>, vector<64x8xf32> -> vector<64x8xf32>
    %18 = arith.addf %11, %17 : vector<64x8xf32>
    %c0_22 = arith.constant 0 : index
    %c0_23 = arith.constant 0 : index
    %c0_24 = arith.constant 0 : index
    %c2 = arith.constant 2 : index
    %c0_25 = arith.constant 0 : index
    %19 = vector.load %arg1[%c0_22, %c0_23, %c0_24, %c2, %c0_25] : memref<1x1x10x10x8xbf16, #tpu.memory_space<vmem>>, vector<1x1x8x8x8xbf16>
    %20 = vector.shape_cast %19 : vector<1x1x8x8x8xbf16> to vector<8x8x8xbf16>
    %21 = vector.shape_cast %20 : vector<8x8x8xbf16> to vector<64x8xbf16>
    %c2_26 = arith.constant 2 : index
    %c0_27 = arith.constant 0 : index
    %c0_28 = arith.constant 0 : index
    %22 = vector.load %arg2[%c2_26, %c0_27, %c0_28] : memref<9x8x8xbf16, #tpu.memory_space<vmem>>, vector<1x8x8xbf16>
    %23 = vector.shape_cast %22 : vector<1x8x8xbf16> to vector<8x8xbf16>
    %cst_29 = arith.constant dense<0.000000e+00> : vector<64x8xf32>
    %24 = tpu.matmul %21, %23, %cst_29 {dimension_numbers = #tpu.dot_dimension_numbers<[1], [0], [0], [1], [0, 0, 1, 1], [], []>} : vector<64x8xbf16>, vector<8x8xbf16>, vector<64x8xf32> -> vector<64x8xf32>
    %25 = arith.addf %18, %24 : vector<64x8xf32>
    %c0_30 = arith.constant 0 : index
    %c0_31 = arith.constant 0 : index
    %c1_32 = arith.constant 1 : index
    %c0_33 = arith.constant 0 : index
    %c0_34 = arith.constant 0 : index
    %26 = vector.load %arg1[%c0_30, %c0_31, %c1_32, %c0_33, %c0_34] : memref<1x1x10x10x8xbf16, #tpu.memory_space<vmem>>, vector<1x1x8x8x8xbf16>
    %27 = vector.shape_cast %26 : vector<1x1x8x8x8xbf16> to vector<8x8x8xbf16>
    %28 = vector.shape_cast %27 : vector<8x8x8xbf16> to vector<64x8xbf16>
    %c3 = arith.constant 3 : index
    %c0_35 = arith.constant 0 : index
    %c0_36 = arith.constant 0 : index
    %29 = vector.load %arg2[%c3, %c0_35, %c0_36] : memref<9x8x8xbf16, #tpu.memory_space<vmem>>, vector<1x8x8xbf16>
    %30 = vector.shape_cast %29 : vector<1x8x8xbf16> to vector<8x8xbf16>
    %cst_37 = arith.constant dense<0.000000e+00> : vector<64x8xf32>
    %31 = tpu.matmul %28, %30, %cst_37 {dimension_numbers = #tpu.dot_dimension_numbers<[1], [0], [0], [1], [0, 0, 1, 1], [], []>} : vector<64x8xbf16>, vector<8x8xbf16>, vector<64x8xf32> -> vector<64x8xf32>
    %32 = arith.addf %25, %31 : vector<64x8xf32>
    %c0_38 = arith.constant 0 : index
    %c0_39 = arith.constant 0 : index
    %c1_40 = arith.constant 1 : index
    %c1_41 = arith.constant 1 : index
    %c0_42 = arith.constant 0 : index
    %33 = vector.load %arg1[%c0_38, %c0_39, %c1_40, %c1_41, %c0_42] : memref<1x1x10x10x8xbf16, #tpu.memory_space<vmem>>, vector<1x1x8x8x8xbf16>
    %34 = vector.shape_cast %33 : vector<1x1x8x8x8xbf16> to vector<8x8x8xbf16>
    %35 = vector.shape_cast %34 : vector<8x8x8xbf16> to vector<64x8xbf16>
    %c4 = arith.constant 4 : index
    %c0_43 = arith.constant 0 : index
    %c0_44 = arith.constant 0 : index
    %36 = vector.load %arg2[%c4, %c0_43, %c0_44] : memref<9x8x8xbf16, #tpu.memory_space<vmem>>, vector<1x8x8xbf16>
    %37 = vector.shape_cast %36 : vector<1x8x8xbf16> to vector<8x8xbf16>
    %cst_45 = arith.constant dense<0.000000e+00> : vector<64x8xf32>
    %38 = tpu.matmul %35, %37, %cst_45 {dimension_numbers = #tpu.dot_dimension_numbers<[1], [0], [0], [1], [0, 0, 1, 1], [], []>} : vector<64x8xbf16>, vector<8x8xbf16>, vector<64x8xf32> -> vector<64x8xf32>
    %39 = arith.addf %32, %38 : vector<64x8xf32>
    %c0_46 = arith.constant 0 : index
    %c0_47 = arith.constant 0 : index
    %c1_48 = arith.constant 1 : index
    %c2_49 = arith.constant 2 : index
    %c0_50 = arith.constant 0 : index
    %40 = vector.load %arg1[%c0_46, %c0_47, %c1_48, %c2_49, %c0_50] : memref<1x1x10x10x8xbf16, #tpu.memory_space<vmem>>, vector<1x1x8x8x8xbf16>
    %41 = vector.shape_cast %40 : vector<1x1x8x8x8xbf16> to vector<8x8x8xbf16>
    %42 = vector.shape_cast %41 : vector<8x8x8xbf16> to vector<64x8xbf16>
    %c5 = arith.constant 5 : index
    %c0_51 = arith.constant 0 : index
    %c0_52 = arith.constant 0 : index
    %43 = vector.load %arg2[%c5, %c0_51, %c0_52] : memref<9x8x8xbf16, #tpu.memory_space<vmem>>, vector<1x8x8xbf16>
    %44 = vector.shape_cast %43 : vector<1x8x8xbf16> to vector<8x8xbf16>
    %cst_53 = arith.constant dense<0.000000e+00> : vector<64x8xf32>
    %45 = tpu.matmul %42, %44, %cst_53 {dimension_numbers = #tpu.dot_dimension_numbers<[1], [0], [0], [1], [0, 0, 1, 1], [], []>} : vector<64x8xbf16>, vector<8x8xbf16>, vector<64x8xf32> -> vector<64x8xf32>
    %46 = arith.addf %39, %45 : vector<64x8xf32>
    %c0_54 = arith.constant 0 : index
    %c0_55 = arith.constant 0 : index
    %c2_56 = arith.constant 2 : index
    %c0_57 = arith.constant 0 : index
    %c0_58 = arith.constant 0 : index
    %47 = vector.load %arg1[%c0_54, %c0_55, %c2_56, %c0_57, %c0_58] : memref<1x1x10x10x8xbf16, #tpu.memory_space<vmem>>, vector<1x1x8x8x8xbf16>
    %48 = vector.shape_cast %47 : vector<1x1x8x8x8xbf16> to vector<8x8x8xbf16>
    %49 = vector.shape_cast %48 : vector<8x8x8xbf16> to vector<64x8xbf16>
    %c6 = arith.constant 6 : index
    %c0_59 = arith.constant 0 : index
    %c0_60 = arith.constant 0 : index
    %50 = vector.load %arg2[%c6, %c0_59, %c0_60] : memref<9x8x8xbf16, #tpu.memory_space<vmem>>, vector<1x8x8xbf16>
    %51 = vector.shape_cast %50 : vector<1x8x8xbf16> to vector<8x8xbf16>
    %cst_61 = arith.constant dense<0.000000e+00> : vector<64x8xf32>
    %52 = tpu.matmul %49, %51, %cst_61 {dimension_numbers = #tpu.dot_dimension_numbers<[1], [0], [0], [1], [0, 0, 1, 1], [], []>} : vector<64x8xbf16>, vector<8x8xbf16>, vector<64x8xf32> -> vector<64x8xf32>
    %53 = arith.addf %46, %52 : vector<64x8xf32>
    %c0_62 = arith.constant 0 : index
    %c0_63 = arith.constant 0 : index
    %c2_64 = arith.constant 2 : index
    %c1_65 = arith.constant 1 : index
    %c0_66 = arith.constant 0 : index
    %54 = vector.load %arg1[%c0_62, %c0_63, %c2_64, %c1_65, %c0_66] : memref<1x1x10x10x8xbf16, #tpu.memory_space<vmem>>, vector<1x1x8x8x8xbf16>
    %55 = vector.shape_cast %54 : vector<1x1x8x8x8xbf16> to vector<8x8x8xbf16>
    %56 = vector.shape_cast %55 : vector<8x8x8xbf16> to vector<64x8xbf16>
    %c7 = arith.constant 7 : index
    %c0_67 = arith.constant 0 : index
    %c0_68 = arith.constant 0 : index
    %57 = vector.load %arg2[%c7, %c0_67, %c0_68] : memref<9x8x8xbf16, #tpu.memory_space<vmem>>, vector<1x8x8xbf16>
    %58 = vector.shape_cast %57 : vector<1x8x8xbf16> to vector<8x8xbf16>
    %cst_69 = arith.constant dense<0.000000e+00> : vector<64x8xf32>
    %59 = tpu.matmul %56, %58, %cst_69 {dimension_numbers = #tpu.dot_dimension_numbers<[1], [0], [0], [1], [0, 0, 1, 1], [], []>} : vector<64x8xbf16>, vector<8x8xbf16>, vector<64x8xf32> -> vector<64x8xf32>
    %60 = arith.addf %53, %59 : vector<64x8xf32>
    %c0_70 = arith.constant 0 : index
    %c0_71 = arith.constant 0 : index
    %c2_72 = arith.constant 2 : index
    %c2_73 = arith.constant 2 : index
    %c0_74 = arith.constant 0 : index
    %61 = vector.load %arg1[%c0_70, %c0_71, %c2_72, %c2_73, %c0_74] : memref<1x1x10x10x8xbf16, #tpu.memory_space<vmem>>, vector<1x1x8x8x8xbf16>
    %62 = vector.shape_cast %61 : vector<1x1x8x8x8xbf16> to vector<8x8x8xbf16>
    %63 = vector.shape_cast %62 : vector<8x8x8xbf16> to vector<64x8xbf16>
    %c8 = arith.constant 8 : index
    %c0_75 = arith.constant 0 : index
    %c0_76 = arith.constant 0 : index
    %64 = vector.load %arg2[%c8, %c0_75, %c0_76] : memref<9x8x8xbf16, #tpu.memory_space<vmem>>, vector<1x8x8xbf16>
    %65 = vector.shape_cast %64 : vector<1x8x8xbf16> to vector<8x8xbf16>
    %cst_77 = arith.constant dense<0.000000e+00> : vector<64x8xf32>
    %66 = tpu.matmul %63, %65, %cst_77 {dimension_numbers = #tpu.dot_dimension_numbers<[1], [0], [0], [1], [0, 0, 1, 1], [], []>} : vector<64x8xbf16>, vector<8x8xbf16>, vector<64x8xf32> -> vector<64x8xf32>
    %67 = arith.addf %60, %66 : vector<64x8xf32>
    %c0_78 = arith.constant 0 : index
    %c0_79 = arith.constant 0 : index
    %c0_80 = arith.constant 0 : index
    %68 = vector.load %arg5[%c0_78, %c0_79, %c0_80] : memref<1x64x8xf32, #tpu.memory_space<vmem>>, vector<1x64x8xf32>
    %69 = vector.shape_cast %68 : vector<1x64x8xf32> to vector<64x8xf32>
    %70 = vector.shape_cast %67 : vector<64x8xf32> to vector<1x64x8xf32>
    tpu.vector_store %arg5[%c0_78, %c0_79, %c0_80], %70 {strides = array<i32>} : memref<1x64x8xf32, #tpu.memory_space<vmem>>, vector<1x64x8xf32>,
    return
  }
  func.func @transform_0(%arg0: i32) -> (i32, i32, i32, i32, i32) {
    %c0_i32 = arith.constant 0 : i32
    %c0_i32_0 = arith.constant 0 : i32
    %c0_i32_1 = arith.constant 0 : i32
    %c0_i32_2 = arith.constant 0 : i32
    %c0_i32_3 = arith.constant 0 : i32
    return %arg0, %c0_i32, %c0_i32_0, %c0_i32_1, %c0_i32_2 : i32, i32, i32, i32, i32
  }
  func.func @transform_1(%arg0: i32) -> (i32, i32, i32) {
    %c0_i32 = arith.constant 0 : i32
    %c0_i32_0 = arith.constant 0 : i32
    %c0_i32_1 = arith.constant 0 : i32
    %c0_i32_2 = arith.constant 0 : i32
    return %c0_i32, %c0_i32_0, %c0_i32_1 : i32, i32, i32
  }
  func.func @transform_2(%arg0: i32) -> (i32, i32, i32, i32) {
    %c0_i32 = arith.constant 0 : i32
    %c0_i32_0 = arith.constant 0 : i32
    %c0_i32_1 = arith.constant 0 : i32
    %c0_i32_2 = arith.constant 0 : i32
    return %arg0, %c0_i32, %c0_i32_0, %c0_i32_1 : i32, i32, i32, i32
  }
  func.func @transform_3(%arg0: i32) -> (i32, i32) {
    %c0_i32 = arith.constant 0 : i32
    %c0_i32_0 = arith.constant 0 : i32
    %c0_i32_1 = arith.constant 0 : i32
    return %c0_i32, %c0_i32_0 : i32, i32
  }
  func.func @transform_4(%arg0: i32) -> (i32, i32, i32) {
    %c0_i32 = arith.constant 0 : i32
    %c0_i32_0 = arith.constant 0 : i32
    %c0_i32_1 = arith.constant 0 : i32
    return %arg0, %c0_i32, %c0_i32_0 : i32, i32, i32
  }
}

</mosaic_0001>

<bundles_post_ra>
// kernel: basic_block_pallas.2
= control target key start
LH: loop header
LB: loop body
LE: loop exit
PB: predicated region body
PF: predicated region fallthrough
CT: control target
= control target key end

     0   :  { %s1566_s9 = smov 0   ;;  %s1887_s0 = inlined_call_operand.vmem [shape: bf16[2,4,9,9,4], index: 0, kind: input, shape index: {}]   ;;  %s1888_s1 = inlined_call_operand.vmem [shape: bf16[9,4,8], index: 1, kind: input, shape index: {}]   ;;  %s1889_s2 = inlined_call_operand.vmem [shape: bf16[2,64,8], index: 2, kind: output, shape index: {}]  }
   0x1 LB: > { %s1284_s10 = sadd.s32 4294967295, %s1549_s9   ;;  %p1288_p0 = scmp.ge.s32.totalorder %s1549_s9, 1  ;;  %s1549_s9 = sphi %s1566_s9, %s12_s9  }
   0x2   : > { %p112_p1 = scmp.lt.s32.totalorder %s1549_s9, 3 }
   0x4   : > { %p113_p2 = pnand %p1288_p0, %p112_p1 }
   0x5   : > { %p134_p3 = scmp.lt.s32.totalorder (!%p113_p2), %s1284_s10, 1 }
   0x6   : > { %116 = sbr.rel (%p113_p2) target bundleno = 297 (0x129), region = 28 }
   0xb   : > { %v1300_v0 = vld [vmem:[%s1888_s1 + $0x2] sm:$0x3]  ;;  %vm198_vm0 = vcmask 1041408   ;;  %v1341_v2 = vld [vmem:[%s1888_s1 + $0x4] sm:$0x3]  ;;  %s1893_s10 = smov (!%p134_p3, %s1284_s10), 1 }
   0xc   : > { %v200_v1 = vsel %vm198_vm0, %v1300_v0, 0  ;;  %v1354_v3 = vld [vmem:[%s1888_s1 + $0x6] sm:$0x3]  ;;  %v453_v4 = vsel %vm198_vm0, %v1341_v2, 0  ;;  %v153_v6 = vld [vmem:[%s1888_s1] sm:$0x3] }
   0xd   : > { %1531 = vmatpush.bf16.msra.mxu1 %v200_v1  ;;  %1532 = vmatpush.bf16.msra.mxu2 %v200_v1  ;;  %v536_v5 = vsel %vm198_vm0, %v1354_v3, 0  ;;  %v264_v7 = vsel %vm198_vm0, %v153_v6, 0  ;;  %v1383_v8 = vld [vmem:[%s1888_s1 + $0x8] sm:$0x3]  ;;  %s1534_s21 = smul.u32 288, %s1893_s10  ;;  %vm185_vm1 = vcmask 31744  }
   0xe   : > { %1533 = vmatpush.bf16.msra.mxu3 %v200_v1  ;;  %209 = vmatpush.bf16.msra.mxu0 %v200_v1  ;;  %v619_v9 = vsel %vm198_vm0, %v1383_v8, 0  ;;  %v1433_v10 = vld [vmem:[%s1888_s1 + $0xc] sm:$0x3]  ;;  %v1462_v11 = vld [vmem:[%s1888_s1 + $0xe] sm:$0x3]  ;;  %s1506_s5 = sshll.u32 %s1893_s10, 5 }
   0xf   : > { %s1600_s24 = scalar_lea.vmem %s1887_s0, %s1534_s21  ;;  %v1420_v12 = vld [vmem:[%s1888_s1 + $0xa] sm:$0x3]  ;;  %v896_v24 = vsel %vm198_vm0, %v1433_v10, 0  ;;  %v979_v28 = vsel %vm198_vm0, %v1462_v11, 0  ;;  %v1499_v38 = vld [vmem:[%s1888_s1 + $0x10] sm:$0x3]  ;;  %s1846_s8 = scalar_lea.vmem %s1889_s2, %s1506_s5 }
  0x10   : > { %v1307_v13 = vld [vmem:[%s1600_s24 + $0x58] sm:$0xf]  ;;  %v1512_v14 = vld [vmem:[%s1600_s24 + $0x5c] sm:$0xf0]  ;;  %v1311_v15 = vld [vmem:[%s1600_s24 + $0x68] sm:$0xf] }
  0x11   : > { %462 = vmatpush.bf16.msrb.mxu2 %v453_v4  ;;  %273 = vmatpush.bf16.msrb.mxu1 %v264_v7  ;;  %v1308_v16 = vor.u32 %v1512_v14, %v1307_v13  ;;  %v1513_v17 = vld [vmem:[%s1600_s24 + $0x6c] sm:$0xf0]  ;;  %v1315_v18 = vld [vmem:[%s1600_s24 + $0x78] sm:$0xf]  ;;  %v1514_v19 = vld [vmem:[%s1600_s24 + $0x7c] sm:$0xf0] }
  0x12   : > { %545 = vmatpush.bf16.msrb.mxu3 %v536_v5  ;;  %628 = vmatpush.bf16.msrb.mxu0 %v619_v9  ;;  %v1312_v20 = vor.u32 %v1513_v17, %v1311_v15  ;;  %v1316_v21 = vor.u32 %v1514_v19, %v1315_v18  ;;  %v1303_v22 = vld [vmem:[%s1600_s24 + $0x48] sm:$0xf]  ;;  %v1511_v23 = vld [vmem:[%s1600_s24 + $0x4c] sm:$0xf0]  ;;  %v295_v26 = vld [vmem:[%s1600_s24] sm:$0xf] }
  0x13   : > { %1318 = vmatmul.msk.bf16.vlgmr.msra.gmra.mxu1 %vm185_vm1, %v1308_v16  ;;  %v1304_v25 = vor.u32 %v1511_v23, %v1303_v22  ;;  %v296_v27 = vld [vmem:[%s1600_s24 + $0x4] sm:$0x1]  ;;  %v813_v29 = vsel %vm198_vm0, %v1420_v12, 0  ;;  %v297_v30 = vld [vmem:[%s1600_s24 + $0x8] sm:$0xf]  ;;  %v315_v32 = vshrl.u32 %v295_v26, 16 }
  0x14   : > { %1319 = vmatmul.msk.bf16.vlgmr.msra.gmra.mxu2 %vm185_vm1, %v1312_v20  ;;  %1320 = vmatmul.msk.bf16.vlgmr.msra.gmra.mxu3 %vm185_vm1, %v1316_v21  ;;  %v298_v31 = vld [vmem:[%s1600_s24 + $0xc] sm:$0x1]  ;;  %v318_v33 = vshll.u32 %v295_v26, 16  ;;  %v324_v34 = vshll.u32 %v296_v27, 16  ;;  %v329_v35 = vshrl.u32 %v297_v30, 16  ;;  %v332_v36 = vshll.u32 %v297_v30, 16 }
  0x15   : > { %1317 = vmatmul.msk.bf16.vlgmr.msra.gmra.mxu0 %vm185_vm1, %v1304_v25  ;;  %v338_v37 = vshll.u32 %v298_v31, 16  ;;  %905 = vmatpush.bf16.msra.mxu2 %v896_v24  ;;  %vm311_vm2 = vsmask.f32 3328  ;;  %vm312_vm3 = vsmask.f32 7440  ;;  %v317_v39 = vrot.slane %v315_v32, 4 }
  0x16   : > { %v320_v40 = vrot.slane %v318_v33, 5  ;;  %988 = vmatpush.bf16.msra.mxu3 %v979_v28  ;;  %822 = vmatpush.bf16.msra.mxu1 %v813_v29  ;;  %v331_v41 = vrot.slane %v329_v35, 4  ;;  %v334_v42 = vrot.slane %v332_v36, 5  ;;  %v326_v44 = vrot.slane %v324_v34, 5  ;;  %vm1634_vm4 = vmor %vm311_vm2, %vm312_vm3  ;;  %v299_v49 = vld [vmem:[%s1600_s24 + $0x10] sm:$0xf] }
  0x17   : > { %v1173_v45 = vsel %vm198_vm0, %v1499_v38, 0  ;;  %v340_v48 = vrot.slane %v338_v37, 5  ;;  %v301_v50 = vld [vmem:[%s1600_s24 + $0x18] sm:$0xf]  ;;  %v1323_v51 = vld [vmem:[%s1600_s24] sm:$0xf] }
  0x18   : > { %v321_v43 = vor.u32 %v320_v40, %v317_v39  ;;  %v335_v47 = vor.u32 %v334_v42, %v331_v41  ;;  %1182 = vmatpush.bf16.msra.mxu0 %v1173_v45  ;;  %v343_v53 = vshrl.u32 %v299_v49, 16  ;;  %v346_v54 = vshll.u32 %v299_v49, 16  ;;  %v1507_v55 = vld [vmem:[%s1600_s24 + $0x4] sm:$0xf0]  ;;  %v1357_v60 = vld [vmem:[%s1600_s24 + $0x90] sm:$0xf] }
  0x19   : > { %v357_v57 = vshrl.u32 %v301_v50, 16  ;;  %v360_v58 = vshll.u32 %v301_v50, 16  ;;  %v1515_v61 = vld [vmem:[%s1600_s24 + $0x94] sm:$0xf0]  ;;  %v1519_v3 = vld [vmem:[%s1600_s24 + $0xdc] sm:$0xf0]  ;;  %v1324_v9 = vor.u32 %v1507_v55, %v1323_v51 }
  0x1a   : > { %v322_v52 = vrot.slane %v321_v43, 4  ;;  %v336_v56 = vrot.slane %v335_v47, 4  ;;  %v345_v62 = vrot.slane %v343_v53, 4  ;;  %v348_v63 = vrot.slane %v346_v54, 5  ;;  %v1386_v2 = vld [vmem:[%s1600_s24 + $0xd8] sm:$0xf] }
  0x1b   : > { %v359_v4 = vrot.slane %v357_v57, 4  ;;  %v362_v5 = vrot.slane %v360_v58, 5  ;;  %v300_v7 = vld [vmem:[%s1600_s24 + $0x14] sm:$0x1]  ;;  %v302_v8 = vld [vmem:[%s1600_s24 + $0x1c] sm:$0x1]  ;;  %v1358_v11 = vor.u32 %v1515_v61, %v1357_v60  ;;  %v1387_v12 = vor.u32 %v1519_v3, %v1386_v2 }
  0x1c   : > { %v327_v59 = vsel %vm1634_vm4, %v322_v52, %v326_v44  ;;  %v341_v0 = vsel %vm1634_vm4, %v336_v56, %v340_v48  ;;  %v349_v13 = vor.u32 %v348_v63, %v345_v62  ;;  %v352_v14 = vshll.u32 %v300_v7, 16  ;;  %v303_v21 = vld [vmem:[%s1600_s24 + $0x20] sm:$0xf]  ;;  %v305_v22 = vld [vmem:[%s1600_s24 + $0x28] sm:$0xf] }
  0x1d   : > { %v428_v1 = vunpack.c.l.b16 %v327_v59  ;;  %v429_v6 = vunpack.c.l.b16 %v341_v0  ;;  %v363_v15 = vor.u32 %v362_v5, %v359_v4  ;;  %v366_v16 = vshll.u32 %v302_v8, 16  ;;  %v1327_v29 = vld [vmem:[%s1600_s24 + $0x10] sm:$0xf]  ;;  %v1508_v30 = vld [vmem:[%s1600_s24 + $0x14] sm:$0xf0] }
  0x1e   : > { %v350_v17 = vrot.slane %v349_v13, 4  ;;  %v354_v18 = vrot.slane %v352_v14, 5  ;;  %v371_v23 = vshrl.u32 %v303_v21, 16  ;;  %v374_v24 = vshll.u32 %v303_v21, 16  ;;  %v1361_v33 = vld [vmem:[%s1600_s24 + $0xa0] sm:$0xf] }
  0x1f   : > { %v436_v10 = vpack.c.b16 %v429_v6, %v428_v1  ;;  %v364_v19 = vrot.slane %v363_v15, 4  ;;  %v368_v20 = vrot.slane %v366_v16, 5  ;;  %v385_v27 = vshrl.u32 %v305_v22, 16  ;;  %v1516_v34 = vld [vmem:[%s1600_s24 + $0xa4] sm:$0xf0] }
  0x20   : > { %v355_v25 = vsel %vm1634_vm4, %v350_v17, %v354_v18  ;;  %v388_v28 = vshll.u32 %v305_v22, 16  ;;  %v1390_v35 = vld [vmem:[%s1600_s24 + $0xe8] sm:$0xf]  ;;  %v1520_v36 = vld [vmem:[%s1600_s24 + $0xec] sm:$0xf0]  ;;  %v373_v37 = vrot.slane %v371_v23, 4  ;;  %v1328_v43 = vor.u32 %v1508_v30, %v1327_v29 }
  0x21   : > { %v369_v26 = vsel %vm1634_vm4, %v364_v19, %v368_v20  ;;  %v430_v31 = vunpack.c.l.b16 %v355_v25  ;;  %v376_v38 = vrot.slane %v374_v24, 5  ;;  %v387_v39 = vrot.slane %v385_v27, 4  ;;  %v304_v41 = vld [vmem:[%s1600_s24 + $0x24] sm:$0x1]  ;;  %v306_v42 = vld [vmem:[%s1600_s24 + $0x2c] sm:$0x1] }
  0x22   : > { %v431_v32 = vunpack.c.l.b16 %v369_v26  ;;  %v390_v40 = vrot.slane %v388_v28, 5  ;;  %v1362_v45 = vor.u32 %v1516_v34, %v1361_v33  ;;  %v1391_v47 = vor.u32 %v1520_v36, %v1390_v35  ;;  %v307_v52 = vld [vmem:[%s1600_s24 + $0x30] sm:$0xf]  ;;  %v309_v53 = vld [vmem:[%s1600_s24 + $0x38] sm:$0xf] }
  0x23   : > { %1337 = vmatmul.msk.bf16.vlgmr.msrb.gmra.mxu1 %vm185_vm1, %v1324_v9  ;;  %v377_v48 = vor.u32 %v376_v38, %v373_v37  ;;  %v380_v49 = vshll.u32 %v304_v41, 16  ;;  %v394_v51 = vshll.u32 %v306_v42, 16  ;;  %v399_v58 = vshrl.u32 %v307_v52, 16  ;;  %v308_v4 = vld [vmem:[%s1600_s24 + $0x34] sm:$0x1] }
  0x24   : > { %1342 = vmatmul.msk.bf16.vlgmr.msrb.gmra.mxu2 %vm185_vm1, %v436_v10  ;;  %1371 = vmatmul.msk.bf16.vlgmr.msrb.gmra.mxu3 %vm185_vm1, %v1358_v11  ;;  %v437_v44 = vpack.c.b16 %v431_v32, %v430_v31  ;;  %v391_v50 = vor.u32 %v390_v40, %v387_v39  ;;  %v402_v59 = vshll.u32 %v307_v52, 16  ;;  %v413_v60 = vshrl.u32 %v309_v53, 16  ;;  %v310_v5 = vld [vmem:[%s1600_s24 + $0x3c] sm:$0x1]  ;;  %v1331_v6 = vld [vmem:[%s1600_s24 + $0x20] sm:$0xf] }
  0x25   : > { %1400 = vmatmul.msk.bf16.vlgmr.msrb.gmra.mxu0 %vm185_vm1, %v1387_v12  ;;  %v378_v54 = vrot.slane %v377_v48, 4  ;;  %v382_v55 = vrot.slane %v380_v49, 5  ;;  %v396_v57 = vrot.slane %v394_v51, 5  ;;  %v416_v61 = vshll.u32 %v309_v53, 16  ;;  %v1509_v7 = vld [vmem:[%s1600_s24 + $0x24] sm:$0xf0] }
  0x26   : > { %v392_v56 = vrot.slane %v391_v50, 4  ;;  %v401_v0 = vrot.slane %v399_v58, 4  ;;  %v404_v1 = vrot.slane %v402_v59, 5  ;;  %v415_v2 = vrot.slane %v413_v60, 4  ;;  %v1365_v10 = vld [vmem:[%s1600_s24 + $0xb0] sm:$0xf] }
  0x27   : > { %v383_v62 = vsel %vm1634_vm4, %v378_v54, %v382_v55  ;;  %v418_v3 = vrot.slane %v416_v61, 5  ;;  %v1517_v11 = vld [vmem:[%s1600_s24 + $0xb4] sm:$0xf0]  ;;  %v1521_v13 = vld [vmem:[%s1600_s24 + $0xfc] sm:$0xf0]  ;;  %v408_v15 = vshll.u32 %v308_v4, 16  ;;  %v1332_v18 = vor.u32 %v1509_v7, %v1331_v6 }
  0x28   : > { %v397_v63 = vsel %vm1634_vm4, %v392_v56, %v396_v57  ;;  %v432_v8 = vunpack.c.l.b16 %v383_v62  ;;  %v1394_v12 = vld [vmem:[%s1600_s24 + $0xf8] sm:$0xf]  ;;  %v405_v14 = vor.u32 %v404_v1, %v401_v0  ;;  %v422_v17 = vshll.u32 %v310_v5, 16  ;;  %v1404_v26 = vld [vmem:[%s1600_s24 + $0x90] sm:$0xf] }
  0x29   : > { %v433_v9 = vunpack.c.l.b16 %v397_v63  ;;  %v419_v16 = vor.u32 %v418_v3, %v415_v2  ;;  %v1366_v20 = vor.u32 %v1517_v11, %v1365_v10  ;;  %v1395_v21 = vor.u32 %v1521_v13, %v1394_v12  ;;  %v1406_v27 = vld [vmem:[%s1600_s24 + $0x98] sm:$0xf]  ;;  %v1483_v28 = vld [vmem:[%s1600_s24 + $0x8] sm:$0xf]  ;;  %v1485_v29 = vld [vmem:[%s1600_s24 + $0x10] sm:$0xf] }
  0x2a   : > { %v406_v22 = vrot.slane %v405_v14, 4  ;;  %v410_v23 = vrot.slane %v408_v15, 5  ;;  %v424_v25 = vrot.slane %v422_v17, 5  ;;  %v675_v32 = vshrl.u32 %v1404_v26, 16  ;;  %v1335_v40 = vld [vmem:[%s1600_s24 + $0x30] sm:$0xf] }
  0x2b   : > { %v438_v19 = vpack.c.b16 %v433_v9, %v432_v8  ;;  %v420_v24 = vrot.slane %v419_v16, 4  ;;  %v678_v33 = vshll.u32 %v1404_v26, 16  ;;  %v689_v34 = vshrl.u32 %v1406_v27, 16  ;;  %v1510_v41 = vld [vmem:[%s1600_s24 + $0x34] sm:$0xf0] }
  0x2c   : > { %v411_v30 = vsel %vm1634_vm4, %v406_v22, %v410_v23  ;;  %v692_v35 = vshll.u32 %v1406_v27, 16  ;;  %v1035_v36 = vshrl.u32 %v1483_v28, 16  ;;  %v1038_v37 = vshll.u32 %v1483_v28, 16  ;;  %v1407_v52 = vld [vmem:[%s1600_s24 + $0x9c] sm:$0x1] }
  0x2d   : > { %v425_v31 = vsel %vm1634_vm4, %v420_v24, %v424_v25  ;;  %v1049_v38 = vshrl.u32 %v1485_v29, 16  ;;  %v1052_v39 = vshll.u32 %v1485_v29, 16  ;;  %v434_v42 = vunpack.c.l.b16 %v411_v30  ;;  %v1484_v57 = vld [vmem:[%s1600_s24 + $0xc] sm:$0x1]  ;;  %v1486_v58 = vld [vmem:[%s1600_s24 + $0x14] sm:$0x1] }
  0x2e   : > { %v677_v48 = vrot.slane %v675_v32, 4  ;;  %v680_v49 = vrot.slane %v678_v33, 5  ;;  %v691_v50 = vrot.slane %v689_v34, 4  ;;  %v694_v51 = vrot.slane %v692_v35, 5  ;;  %v1398_v62 = vld [vmem:[%s1600_s24 + $0x108] sm:$0xf] }
  0x2f   : > { %v1037_v53 = vrot.slane %v1035_v36, 4  ;;  %v1040_v54 = vrot.slane %v1038_v37, 5  ;;  %v1051_v55 = vrot.slane %v1049_v38, 4  ;;  %v1054_v56 = vrot.slane %v1052_v39, 5  ;;  %v1522_v63 = vld [vmem:[%s1600_s24 + $0x10c] sm:$0xf0] }
  0x30   : > { %v1336_v59 = vor.u32 %v1510_v41, %v1335_v40  ;;  %v681_v0 = vor.u32 %v680_v49, %v677_v48  ;;  %v695_v2 = vor.u32 %v694_v51, %v691_v50  ;;  %v698_v3 = vshll.u32 %v1407_v52, 16  ;;  %v1408_v9 = vld [vmem:[%s1600_s24 + $0xa0] sm:$0xf]  ;;  %v1410_v10 = vld [vmem:[%s1600_s24 + $0xa8] sm:$0xf] }
  0x31   : > { %v1041_v4 = vor.u32 %v1040_v54, %v1037_v53  ;;  %v1044_v5 = vshll.u32 %v1484_v57, 16  ;;  %v1055_v6 = vor.u32 %v1054_v56, %v1051_v55  ;;  %v1058_v7 = vshll.u32 %v1486_v58, 16  ;;  %v1487_v23 = vld [vmem:[%s1600_s24 + $0x18] sm:$0xf]  ;;  %v1489_v24 = vld [vmem:[%s1600_s24 + $0x20] sm:$0xf] }
  0x32   : > { %v1399_v8 = vor.u32 %v1522_v63, %v1398_v62  ;;  %v682_v11 = vrot.slane %v681_v0, 4  ;;  %v696_v13 = vrot.slane %v695_v2, 4  ;;  %v700_v14 = vrot.slane %v698_v3, 5  ;;  %v1409_v29 = vld [vmem:[%s1600_s24 + $0xa4] sm:$0x1] }
  0x33   : > { %1338 = vmatmul.msk.bf16.gmra.mxu1 %vm185_vm1, %v1328_v43  ;;  %v435_v43 = vunpack.c.l.b16 %v425_v31  ;;  %v1042_v15 = vrot.slane %v1041_v4, 4  ;;  %v1046_v16 = vrot.slane %v1044_v5, 5  ;;  %v1056_v17 = vrot.slane %v1055_v6, 4  ;;  %v1411_v34 = vld [vmem:[%s1600_s24 + $0xac] sm:$0x1] }
  0x34   : > { %1343 = vmatmul.msk.bf16.gmra.mxu2 %vm185_vm1, %v437_v44  ;;  %1372 = vmatmul.msk.bf16.gmra.mxu3 %vm185_vm1, %v1362_v45  ;;  %v1369_v44 = vld [vmem:[%s1600_s24 + $0xc0] sm:$0xf]  ;;  %v1518_v45 = vld [vmem:[%s1600_s24 + $0xc4] sm:$0xf0]  ;;  %v720_v22 = vshll.u32 %v1410_v10, 16  ;;  %v701_v26 = vsel %vm1634_vm4, %v696_v13, %v700_v14  ;;  %v1063_v35 = vshrl.u32 %v1487_v23, 16 }
  0x35   : > { %1401 = vmatmul.msk.bf16.gmra.mxu0 %vm185_vm1, %v1391_v47  ;;  %v1405_v47 = vld [vmem:[%s1600_s24 + $0x94] sm:$0x1]  ;;  %v439_v60 = vpack.c.b16 %v435_v43, %v434_v42  ;;  %v1370_v61 = vor.u32 %v1518_v45, %v1369_v44  ;;  %v1047_v27 = vsel %vm1634_vm4, %v1042_v15, %v1046_v16  ;;  %v1066_v36 = vshll.u32 %v1487_v23, 16  ;;  %v1436_v41 = vld [vmem:[%s1600_s24 + $0x8] sm:$0xf] }
  0x36   : > { %v684_v1 = vshll.u32 %v1405_v47, 16  ;;  %v722_v33 = vrot.slane %v720_v22, 5  ;;  %v1077_v37 = vshrl.u32 %v1489_v24, 16  ;;  %v1080_v38 = vshll.u32 %v1489_v24, 16  ;;  %v1523_v42 = vld [vmem:[%s1600_s24 + $0xc] sm:$0xf0] }
  0x37   : > { %v789_v40 = vunpack.c.l.b16 %v701_v26  ;;  %v1148_v43 = vunpack.c.l.b16 %v1047_v27  ;;  %v1465_v45 = vld [vmem:[%s1600_s24 + $0x50] sm:$0xf]  ;;  %v1527_v47 = vld [vmem:[%s1600_s24 + $0x54] sm:$0xf0]  ;;  %v712_v49 = vshll.u32 %v1409_v29, 16  ;;  %v726_v51 = vshll.u32 %v1411_v34, 16 }
  0x38   : > { %v686_v12 = vrot.slane %v684_v1, 5  ;;  %v1065_v52 = vrot.slane %v1063_v35, 4  ;;  %v1068_v53 = vrot.slane %v1066_v36, 5  ;;  %v1079_v54 = vrot.slane %v1077_v37, 4  ;;  %v1488_v57 = vld [vmem:[%s1600_s24 + $0x1c] sm:$0x1] }
  0x39   : > { %v1082_v55 = vrot.slane %v1080_v38, 5  ;;  %v1490_v58 = vld [vmem:[%s1600_s24 + $0x24] sm:$0x1]  ;;  %v714_v63 = vrot.slane %v712_v49, 5  ;;  %v728_v1 = vrot.slane %v726_v51, 5  ;;  %v1072_v3 = vshll.u32 %v1488_v57, 16 }
  0x3a   : > { %v687_v25 = vsel %vm1634_vm4, %v682_v11, %v686_v12  ;;  %v1069_v2 = vor.u32 %v1068_v53, %v1065_v52  ;;  %v1086_v5 = vshll.u32 %v1490_v58, 16  ;;  %v1412_v6 = vld [vmem:[%s1600_s24 + $0xb0] sm:$0xf]  ;;  %v1524_v29 = vld [vmem:[%s1600_s24 + $0x1c] sm:$0xf0]  ;;  %vm1220_vm5 = vcmask 60416  }
  0x3b   : > { %v788_v39 = vunpack.c.l.b16 %v687_v25  ;;  %v1083_v4 = vor.u32 %v1082_v55, %v1079_v54  ;;  %v1074_v12 = vrot.slane %v1072_v3, 5  ;;  %v1493_v15 = vld [vmem:[%s1600_s24 + $0x30] sm:$0xf]  ;;  %v731_v16 = vshrl.u32 %v1412_v6, 16  ;;  %v1413_v35 = vld [vmem:[%s1600_s24 + $0xb4] sm:$0x1] }
  0x3c   : > { %v1070_v11 = vrot.slane %v1069_v2, 4  ;;  %v1088_v14 = vrot.slane %v1086_v5, 5  ;;  %v1105_v22 = vshrl.u32 %v1493_v15, 16  ;;  %v1108_v23 = vshll.u32 %v1493_v15, 16  ;;  %v1415_v36 = vld [vmem:[%s1600_s24 + $0xbc] sm:$0x1] }
  0x3d   : > { %v796_v56 = vpack.c.b16 %v789_v40, %v788_v39  ;;  %v1084_v13 = vrot.slane %v1083_v4, 4  ;;  %v1528_v39 = vld [vmem:[%s1600_s24 + $0x64] sm:$0xf0]  ;;  %v740_v49 = vshll.u32 %v1413_v35, 16  ;;  %v754_v51 = vshll.u32 %v1415_v36, 16 }
  0x3e   : > { %v1075_v26 = vsel %vm1634_vm4, %v1070_v11, %v1074_v12  ;;  %v1416_v3 = vld [vmem:[%s1600_s24 + $0xc0] sm:$0xf]  ;;  %v1418_v4 = vld [vmem:[%s1600_s24 + $0xc8] sm:$0xf] }
  0x3f   : > { %v1089_v27 = vsel %vm1634_vm4, %v1084_v13, %v1088_v14  ;;  %v1150_v40 = vunpack.c.l.b16 %v1075_v26  ;;  %v773_v11 = vshrl.u32 %v1418_v4, 16  ;;  %v776_v12 = vshll.u32 %v1418_v4, 16  ;;  %v1477_v4 = vld [vmem:[%s1600_s24 + $0x80] sm:$0xf] }
  0x43   : > { %1339 = vmatmul.msk.bf16.gmra.mxu1 %vm185_vm1, %v1332_v18  ;;  %v1060_v18 = vrot.slane %v1058_v7, 5  ;;  %v1414_v7 = vld [vmem:[%s1600_s24 + $0xb8] sm:$0xf] }
  0x44   : > { %1344 = vmatmul.msk.bf16.gmra.mxu2 %vm185_vm1, %v438_v19  ;;  %1373 = vmatmul.msk.bf16.gmra.mxu3 %vm185_vm1, %v1366_v20  ;;  %v703_v19 = vshrl.u32 %v1408_v9, 16  ;;  %v706_v20 = vshll.u32 %v1408_v9, 16 }
  0x45   : > { %1402 = vmatmul.msk.bf16.gmra.mxu0 %vm185_vm1, %v1395_v21  ;;  %v717_v21 = vshrl.u32 %v1410_v10, 16  ;;  %v1061_v28 = vsel %vm1634_vm4, %v1056_v17, %v1060_v18  ;;  %v1491_v10 = vld [vmem:[%s1600_s24 + $0x28] sm:$0xf]  ;;  %v734_v17 = vshll.u32 %v1412_v6, 16  ;;  %v745_v18 = vshrl.u32 %v1414_v7, 16 }
  0x46   : > { %v705_v30 = vrot.slane %v703_v19, 4  ;;  %v708_v31 = vrot.slane %v706_v20, 5  ;;  %v1149_v44 = vunpack.c.l.b16 %v1061_v28  ;;  %v748_v19 = vshll.u32 %v1414_v7, 16  ;;  %v1440_v28 = vld [vmem:[%s1600_s24 + $0x18] sm:$0xf] }
  0x47   : > { %v719_v32 = vrot.slane %v717_v21, 4  ;;  %v1091_v20 = vshrl.u32 %v1491_v10, 16  ;;  %v1094_v21 = vshll.u32 %v1491_v10, 16  ;;  %v1441_v52 = vor.u32 %v1524_v29, %v1440_v28  ;;  %v1495_v7 = vld [vmem:[%s1600_s24 + $0x38] sm:$0xf] }
  0x48   : > { %v709_v48 = vor.u32 %v708_v31, %v705_v30  ;;  %v1469_v30 = vld [vmem:[%s1600_s24 + $0x60] sm:$0xf]  ;;  %v733_v31 = vrot.slane %v731_v16, 4  ;;  %v750_v34 = vrot.slane %v748_v19, 5  ;;  %v762_v10 = vshll.u32 %v1416_v3, 16 }
  0x49   : > { %v723_v50 = vor.u32 %v722_v33, %v719_v32  ;;  %v736_v32 = vrot.slane %v734_v17, 5  ;;  %v747_v33 = vrot.slane %v745_v18, 4  ;;  %v1093_v37 = vrot.slane %v1091_v20, 4 }
  0x4a   : > { %v710_v62 = vrot.slane %v709_v48, 4  ;;  %v1096_v38 = vrot.slane %v1094_v21, 5  ;;  %v1470_v53 = vor.u32 %v1528_v39, %v1469_v30  ;;  %v1119_v15 = vshrl.u32 %v1495_v7, 16  ;;  %v1444_v21 = vld [vmem:[%s1600_s24 + $0x28] sm:$0xf] }
  0x4b   : > { %v724_v0 = vrot.slane %v723_v50, 4  ;;  %v737_v48 = vor.u32 %v736_v32, %v733_v31  ;;  %v751_v50 = vor.u32 %v750_v34, %v747_v33  ;;  %v1122_v16 = vshll.u32 %v1495_v7, 16  ;;  %v1417_v31 = vld [vmem:[%s1600_s24 + $0xc4] sm:$0x1]  ;;  %v1419_v32 = vld [vmem:[%s1600_s24 + $0xcc] sm:$0x1] }
  0x4c   : > { %v1097_v54 = vor.u32 %v1096_v38, %v1093_v37  ;;  %v764_v26 = vrot.slane %v762_v10, 5  ;;  %v778_v28 = vrot.slane %v776_v12, 5  ;;  %v1121_v33 = vrot.slane %v1119_v15, 4 }
  0x4d   : > { %v729_v9 = vsel %vm1634_vm4, %v724_v0, %v728_v1  ;;  %v1124_v34 = vrot.slane %v1122_v16, 5 }
  0x4e   : > { %v791_v25 = vunpack.c.l.b16 %v729_v9  ;;  %v759_v9 = vshrl.u32 %v1416_v3, 16  ;;  %v1526_v3 = vld [vmem:[%s1600_s24 + $0x3c] sm:$0xf0] }
  0x53   : > { %1340 = vmatmul.msk.bf16.gmra.mxu1 %vm185_vm1, %v1336_v59  ;;  %v1437_v59 = vor.u32 %v1523_v42, %v1436_v41  ;;  %v1151_v41 = vunpack.c.l.b16 %v1089_v27  ;;  %v1492_v42 = vld [vmem:[%s1600_s24 + $0x2c] sm:$0x1]  ;;  %v775_v27 = vrot.slane %v773_v11, 4 }
  0x54   : > { %1345 = vmatmul.msk.bf16.gmra.mxu2 %vm185_vm1, %v439_v60  ;;  %1374 = vmatmul.msk.bf16.gmra.mxu3 %vm185_vm1, %v1370_v61  ;;  %v1466_v60 = vor.u32 %v1527_v47, %v1465_v45  ;;  %v1156_v61 = vpack.c.b16 %v1149_v44, %v1148_v43  ;;  %v1107_v43 = vrot.slane %v1105_v22, 4  ;;  %v1110_v44 = vrot.slane %v1108_v23, 5  ;;  %v1494_v47 = vld [vmem:[%s1600_s24 + $0x34] sm:$0x1]  ;;  %v1525_v22 = vld [vmem:[%s1600_s24 + $0x2c] sm:$0xf0] }
  0x55   : > { %1403 = vmatmul.msk.bf16.gmra.mxu0 %vm185_vm1, %v1399_v8  ;;  %v715_v8 = vsel %vm1634_vm4, %v710_v62, %v714_v63  ;;  %v1100_v55 = vshll.u32 %v1492_v42, 16  ;;  %v1114_v58 = vshll.u32 %v1494_v47, 16  ;;  %v756_v62 = vrot.slane %v754_v51, 5  ;;  %v1473_v23 = vld [vmem:[%s1600_s24 + $0x70] sm:$0xf] }
  0x56   : > { %v790_v24 = vunpack.c.l.b16 %v715_v8  ;;  %v1111_v57 = vor.u32 %v1110_v44, %v1107_v43  ;;  %v1098_v63 = vrot.slane %v1097_v54, 4  ;;  %v1497_v8 = vld [vmem:[%s1600_s24 + $0x40] sm:$0xf]  ;;  %v1445_v38 = vor.u32 %v1525_v22, %v1444_v21 }
  0x57   : > { %v1102_v0 = vrot.slane %v1100_v55, 5  ;;  %v1116_v2 = vrot.slane %v1114_v58, 5  ;;  %v1133_v17 = vshrl.u32 %v1497_v8, 16  ;;  %v1136_v18 = vshll.u32 %v1497_v8, 16 }
  0x58   : > { %v797_v45 = vpack.c.b16 %v791_v25, %v790_v24  ;;  %v1112_v1 = vrot.slane %v1111_v57, 4  ;;  %v1529_v24 = vld [vmem:[%s1600_s24 + $0x74] sm:$0xf0]  ;;  %v761_v25 = vrot.slane %v759_v9, 4  ;;  %v768_v43 = vshll.u32 %v1417_v31, 16 }
  0x59   : > { %v1103_v13 = vsel %vm1634_vm4, %v1098_v63, %v1102_v0  ;;  %v1135_v35 = vrot.slane %v1133_v17, 4  ;;  %v1138_v36 = vrot.slane %v1136_v18, 5  ;;  %v1474_v39 = vor.u32 %v1529_v24, %v1473_v23 }
  0x5a   : > { %v1117_v14 = vsel %vm1634_vm4, %v1112_v1, %v1116_v2  ;;  %v1152_v29 = vunpack.c.l.b16 %v1103_v13  ;;  %v765_v42 = vor.u32 %v764_v26, %v761_v25  ;;  %v779_v44 = vor.u32 %v778_v28, %v775_v27  ;;  %v1448_v2 = vld [vmem:[%s1600_s24 + $0x38] sm:$0xf] }
  0x5b   : > { %v1153_v30 = vunpack.c.l.b16 %v1117_v14  ;;  %v1449_v10 = vor.u32 %v1526_v3, %v1448_v2 }
  0x5c   : > { %v780_v54 = vrot.slane %v779_v44, 4 }
  0x5d   : > { %v1158_v47 = vpack.c.b16 %v1153_v30, %v1152_v29 }
  0x63   : > { %1421 = vmatmul.msk.bf16.vlgmr.msra.gmra.mxu1 %vm185_vm1, %v796_v56  ;;  %v1157_v56 = vpack.c.b16 %v1151_v41, %v1150_v40  ;;  %v1496_v40 = vld [vmem:[%s1600_s24 + $0x3c] sm:$0x1]  ;;  %v1498_v41 = vld [vmem:[%s1600_s24 + $0x44] sm:$0x1] }
  0x64   : > { %1450 = vmatmul.msk.bf16.vlgmr.msra.gmra.mxu2 %vm185_vm1, %v1437_v59  ;;  %1479 = vmatmul.msk.bf16.vlgmr.msra.gmra.mxu3 %vm185_vm1, %v1466_v60  ;;  %v738_v59 = vrot.slane %v737_v48, 4  ;;  %v742_v60 = vrot.slane %v740_v49, 5  ;;  %v1125_v48 = vor.u32 %v1124_v34, %v1121_v33  ;;  %v1128_v49 = vshll.u32 %v1496_v40, 16 }
  0x65   : > { %1500 = vmatmul.msk.bf16.vlgmr.msra.gmra.mxu0 %vm185_vm1, %v1156_v61  ;;  %v752_v61 = vrot.slane %v751_v50, 4  ;;  %v1139_v50 = vor.u32 %v1138_v36, %v1135_v35  ;;  %v1142_v51 = vshll.u32 %v1498_v41, 16 }
  0x66   : > { %v743_v5 = vsel %vm1634_vm4, %v738_v59, %v742_v60  ;;  %v1130_v57 = vrot.slane %v1128_v49, 5 }
  0x67   : > { %v757_v6 = vsel %vm1634_vm4, %v752_v61, %v756_v62  ;;  %v792_v19 = vunpack.c.l.b16 %v743_v5  ;;  %v1140_v58 = vrot.slane %v1139_v50, 4  ;;  %v1144_v59 = vrot.slane %v1142_v51, 5  ;;  %v1530_v5 = vld [vmem:[%s1600_s24 + $0x84] sm:$0xf0] }
  0x68   : > { %v793_v20 = vunpack.c.l.b16 %v757_v6  ;;  %v1478_v11 = vor.u32 %v1530_v5, %v1477_v4 }
  0x69   : > { %v1145_v63 = vsel %vm1634_vm4, %v1140_v58, %v1144_v59 }
  0x6a   : > { %v798_v37 = vpack.c.b16 %v793_v20, %v792_v19  ;;  %v1155_v7 = vunpack.c.l.b16 %v1145_v63 }
  0x73   : > { %1422 = vmatmul.msk.bf16.gmra.mxu1 %vm185_vm1, %v797_v45  ;;  %v782_v45 = vshll.u32 %v1419_v32, 16 }
  0x74   : > { %1451 = vmatmul.msk.bf16.gmra.mxu2 %vm185_vm1, %v1441_v52  ;;  %1480 = vmatmul.msk.bf16.gmra.mxu3 %vm185_vm1, %v1470_v53  ;;  %v766_v52 = vrot.slane %v765_v42, 4  ;;  %v770_v53 = vrot.slane %v768_v43, 5 }
  0x75   : > { %1501 = vmatmul.msk.bf16.gmra.mxu0 %vm185_vm1, %v1157_v56  ;;  %v784_v55 = vrot.slane %v782_v45, 5  ;;  %v1126_v56 = vrot.slane %v1125_v48, 4 }
  0x76   : > { %v771_v60 = vsel %vm1634_vm4, %v766_v52, %v770_v53 }
  0x77   : > { %v785_v61 = vsel %vm1634_vm4, %v780_v54, %v784_v55  ;;  %v1131_v62 = vsel %vm1634_vm4, %v1126_v56, %v1130_v57  ;;  %v794_v0 = vunpack.c.l.b16 %v771_v60 }
  0x78   : > { %v795_v1 = vunpack.c.l.b16 %v785_v61  ;;  %v1154_v6 = vunpack.c.l.b16 %v1131_v62 }
  0x7a   : > { %v799_v8 = vpack.c.b16 %v795_v1, %v794_v0  ;;  %v1159_v12 = vpack.c.b16 %v1155_v7, %v1154_v6 }
  0x83   : > { %1423 = vmatmul.msk.bf16.gmra.mxu1 %vm185_vm1, %v798_v37 }
  0x84   : > { %1452 = vmatmul.msk.bf16.gmra.mxu2 %vm185_vm1, %v1445_v38  ;;  %1481 = vmatmul.msk.bf16.gmra.mxu3 %vm185_vm1, %v1474_v39 }
  0x85   : > { %1502 = vmatmul.msk.bf16.gmra.mxu0 %vm185_vm1, %v1158_v47 }
  0x90   : > { %v216_v9 = vpop.f32.mrf.mxu1 }
  0x92   : > { %v211_v13 = vpop.f32.mrf.mxu0 }
  0x93   : > { %1424 = vmatmul.msk.bf16.gmra.mxu1 %vm185_vm1, %v799_v8 }
  0x94   : > { %1453 = vmatmul.msk.bf16.gmra.mxu2 %vm185_vm1, %v1449_v10  ;;  %1482 = vmatmul.msk.bf16.gmra.mxu3 %vm185_vm1, %v1478_v11 }
  0x95   : > { %1503 = vmatmul.msk.bf16.gmra.mxu0 %vm185_vm1, %v1159_v12 }
  0x97   : > { %v1802_v46 = vpop.f32.mrf.mxu2  ;;  %v1804_v14 = vpop.f32.mrf.mxu3 }
  0x98   : > { %v1806_v15 = vpop.f32.mrf.mxu1 }
  0x9a   : > { %v213_v16 = vpop.f32.mrf.mxu0 }
  0x9f   : > { %v1808_v17 = vpop.f32.mrf.mxu2  ;;  %v1810_v18 = vpop.f32.mrf.mxu3 }
  0xa0   : > { %v275_v19 = vpop.f32.mrf.mxu1 }
  0xa1   : > { %v276_v49 = vadd.f32 %v275_v19, %v211_v13 }
  0xa2   : > { %v630_v20 = vpop.f32.mrf.mxu0 }
  0xa7   : > { %v464_v21 = vpop.f32.mrf.mxu2  ;;  %v547_v22 = vpop.f32.mrf.mxu3 }
  0xa8   : > { %v277_v23 = vpop.f32.mrf.mxu1  ;;  %v484_v51 = vadd.f32 %v464_v21, %v276_v49 }
  0xa9   : > { %v278_v56 = vadd.f32 %v277_v23, %v213_v16 }
  0xaa   : > { %v632_v24 = vpop.f32.mrf.mxu0  ;;  %v567_v54 = vadd.f32 %v547_v22, %v484_v51 }
  0xac   : > { %v650_v59 = vadd.f32 %v630_v20, %v567_v54 }
  0xaf   : > { %v466_v25 = vpop.f32.mrf.mxu2  ;;  %v549_v26 = vpop.f32.mrf.mxu3 }
  0xb0   : > { %v280_v27 = vpop.f32.mrf.mxu1  ;;  %v485_v58 = vadd.f32 %v466_v25, %v278_v56 }
  0xb1   : > { %v281_v2 = vadd.f32 %v280_v27, %v216_v9 }
  0xb2   : > { %v635_v28 = vpop.f32.mrf.mxu0  ;;  %v568_v63 = vadd.f32 %v549_v26, %v485_v58 }
  0xb4   : > { %v651_v7 = vadd.f32 %v632_v24, %v568_v63 }
  0xb7   : > { %v469_v29 = vpop.f32.mrf.mxu2  ;;  %v552_v30 = vpop.f32.mrf.mxu3 }
  0xb8   : > { %v282_v31 = vpop.f32.mrf.mxu1  ;;  %v486_v5 = vadd.f32 %v469_v29, %v281_v2 }
  0xb9   : > { %v283_v19 = vadd.f32 %v282_v31, %v1806_v15 }
  0xba   : > { %v1812_v32 = vpop.f32.mrf.mxu0  ;;  %v569_v13 = vadd.f32 %v552_v30, %v486_v5 }
  0xbc   : > { %v652_v24 = vadd.f32 %v635_v28, %v569_v13 }
  0xbf   : > { %v471_v33 = vpop.f32.mrf.mxu2  ;;  %v554_v34 = vpop.f32.mrf.mxu3 }
  0xc0   : > { %v285_v35 = vpop.f32.mrf.mxu1  ;;  %v487_v22 = vadd.f32 %v471_v33, %v283_v19 }
  0xc1   : > { %v286_v54 = vadd.f32 %v285_v35, %v1802_v46 }
  0xc2   : > { %v1814_v36 = vpop.f32.mrf.mxu0  ;;  %v570_v49 = vadd.f32 %v554_v34, %v487_v22 }
  0xc4   : > { %v653_v33 = vadd.f32 %v1812_v32, %v570_v49 }
  0xc7   : > { %v474_v37 = vpop.f32.mrf.mxu2  ;;  %v1816_v38 = vpop.f32.mrf.mxu3 }
  0xc8   : > { %v1818_v39 = vpop.f32.mrf.mxu1  ;;  %v488_v15 = vadd.f32 %v474_v37, %v286_v54 }
  0xc9   : > { %v288_v46 = vadd.f32 %v1818_v39, %v1808_v17 }
  0xca   : > { %v1820_v40 = vpop.f32.mrf.mxu0 }
  0xcf   : > { %v1822_v41 = vpop.f32.mrf.mxu2  ;;  %v1824_v42 = vpop.f32.mrf.mxu3 }
  0xd0   : > { %v1826_v43 = vpop.f32.mrf.mxu1  ;;  %v489_v37 = vadd.f32 %v1822_v41, %v288_v46 }
  0xd1   : > { %v291_v17 = vadd.f32 %v1826_v43, %v1804_v14 }
  0xd2   : > { %v1828_v44 = vpop.f32.mrf.mxu0 }
  0xd7   : > { %v1830_v45 = vpop.f32.mrf.mxu2  ;;  %v1832_v47 = vpop.f32.mrf.mxu3 }
  0xd8   : > { %v1834_v48 = vpop.f32.mrf.mxu1  ;;  %v490_v41 = vadd.f32 %v1830_v45, %v291_v17 }
  0xd9   : > { %v293_v14 = vadd.f32 %v1834_v48, %v1810_v18 }
  0xda   : > { %v1836_v50 = vpop.f32.mrf.mxu0 }
  0xdf   : > { %v1838_v52 = vpop.f32.mrf.mxu2  ;;  %v1840_v53 = vpop.f32.mrf.mxu3 }
  0xe0   : > { %v824_v55 = vpop.f32.mrf.mxu1  ;;  %v491_v45 = vadd.f32 %v1838_v52, %v293_v14 }
  0xe1   : > { %v844_v60 = vadd.f32 %v824_v55, %v650_v59 }
  0xe2   : > { %v1184_v57 = vpop.f32.mrf.mxu0 }
  0xe7   : > { %v907_v61 = vpop.f32.mrf.mxu2  ;;  %v990_v62 = vpop.f32.mrf.mxu3 }
  0xe8   : > { %v927_v0 = vadd.f32 %v907_v61, %v844_v60  ;;  %v826_v1 = vpop.f32.mrf.mxu1  ;;  %v571_v60 = vadd.f32 %v1816_v38, %v488_v15  ;;  %v572_v38 = vadd.f32 %v1824_v42, %v489_v37  ;;  %v573_v42 = vadd.f32 %v1832_v47, %v490_v41 }
  0xe9   : > { %v845_v10 = vadd.f32 %v826_v1, %v651_v7  ;;  %v574_v47 = vadd.f32 %v1840_v53, %v491_v45 }
  0xea   : > { %v1010_v3 = vadd.f32 %v990_v62, %v927_v0  ;;  %v1186_v4 = vpop.f32.mrf.mxu0  ;;  %v654_v32 = vadd.f32 %v1814_v36, %v571_v60  ;;  %v655_v36 = vadd.f32 %v1820_v40, %v572_v38  ;;  %v656_v40 = vadd.f32 %v1828_v44, %v573_v42 }
  0xeb   : > { %v657_v52 = vadd.f32 %v1836_v50, %v574_v47 }
  0xec   : > { %v1204_v6 = vadd.f32 %v1184_v57, %v1010_v3 }
  0xee   : > { %v1212_v8 = vpack.c.bf16 %v1204_v6, %v1204_v6 }
  0xef   : > { %v909_v11 = vpop.f32.mrf.mxu2  ;;  %v992_v12 = vpop.f32.mrf.mxu3 }
  0xf0   : > { %1221 = vst.msk [vmem:[%s1846_s8] sm:$0xf] %vm1220_vm5, %v1212_v8  ;;  %v928_v9 = vadd.f32 %v909_v11, %v845_v10  ;;  %v829_v16 = vpop.f32.mrf.mxu1 }
  0xf1   : > { %v846_v26 = vadd.f32 %v829_v16, %v652_v24 }
  0xf2   : > { %v1011_v20 = vadd.f32 %v992_v12, %v928_v9  ;;  %v1189_v21 = vpop.f32.mrf.mxu0 }
  0xf4   : > { %v1205_v23 = vadd.f32 %v1186_v4, %v1011_v20 }
  0xf6   : > { %v1213_v25 = vpack.c.bf16 %v1205_v23, %v1205_v23 }
  0xf7   : > { %v912_v27 = vpop.f32.mrf.mxu2  ;;  %v995_v29 = vpop.f32.mrf.mxu3 }
  0xf8   : > { %1222 = vst.msk [vmem:[%s1846_s8 + $0x4] sm:$0xf] %vm1220_vm5, %v1213_v25  ;;  %v929_v30 = vadd.f32 %v912_v27, %v846_v26  ;;  %v831_v51 = vpop.f32.mrf.mxu1 }
  0xf9   : > { %v847_v28 = vadd.f32 %v831_v51, %v653_v33 }
  0xfa   : > { %v1012_v55 = vadd.f32 %v995_v29, %v929_v30  ;;  %v1191_v56 = vpop.f32.mrf.mxu0 }
  0xfc   : > { %v1206_v31 = vadd.f32 %v1189_v21, %v1012_v55 }
  0xfe   : > { %v1214_v57 = vpack.c.bf16 %v1206_v31, %v1206_v31 }
  0xff   : > { %v914_v58 = vpop.f32.mrf.mxu2  ;;  %v997_v59 = vpop.f32.mrf.mxu3 }
 0x100   : > { %1223 = vst.msk [vmem:[%s1846_s8 + $0x8] sm:$0xf] %vm1220_vm5, %v1214_v57  ;;  %v930_v34 = vadd.f32 %v914_v58, %v847_v28  ;;  %v834_v61 = vpop.f32.mrf.mxu1 }
 0x101   : > { %v848_v1 = vadd.f32 %v834_v61, %v654_v32 }
 0x102   : > { %v1013_v35 = vadd.f32 %v997_v59, %v930_v34  ;;  %v1194_v63 = vpop.f32.mrf.mxu0 }
 0x104   : > { %v1207_v62 = vadd.f32 %v1191_v56, %v1013_v35 }
 0x106   : > { %v1215_v0 = vpack.c.bf16 %v1207_v62, %v1207_v62 }
 0x107   : > { %v917_v2 = vpop.f32.mrf.mxu2  ;;  %v1000_v3 = vpop.f32.mrf.mxu3 }
 0x108   : > { %1224 = vst.msk [vmem:[%s1846_s8 + $0xc] sm:$0xf] %vm1220_vm5, %v1215_v0  ;;  %v931_v4 = vadd.f32 %v917_v2, %v848_v1  ;;  %v836_v5 = vpop.f32.mrf.mxu1 }
 0x109   : > { %v849_v8 = vadd.f32 %v836_v5, %v655_v36 }
 0x10a   : > { %v1014_v39 = vadd.f32 %v1000_v3, %v931_v4  ;;  %v1196_v10 = vpop.f32.mrf.mxu0 }
 0x10c   : > { %v1208_v6 = vadd.f32 %v1194_v63, %v1014_v39 }
 0x10e   : > { %v1216_v7 = vpack.c.bf16 %v1208_v6, %v1208_v6 }
 0x10f   : > { %v919_v11 = vpop.f32.mrf.mxu2  ;;  %v1002_v12 = vpop.f32.mrf.mxu3 }
 0x110   : > { %1225 = vst.msk [vmem:[%s1846_s8 + $0x10] sm:$0xf] %vm1220_vm5, %v1216_v7  ;;  %v932_v13 = vadd.f32 %v919_v11, %v849_v8  ;;  %v839_v9 = vpop.f32.mrf.mxu1 }
 0x111   : > { %v850_v20 = vadd.f32 %v839_v9, %v656_v40 }
 0x112   : > { %v1015_v43 = vadd.f32 %v1002_v12, %v932_v13  ;;  %v1199_v24 = vpop.f32.mrf.mxu0 }
 0x114   : > { %v1209_v16 = vadd.f32 %v1196_v10, %v1015_v43 }
 0x116   : > { %v1217_v19 = vpack.c.bf16 %v1209_v16, %v1209_v16 }
 0x117   : > { %v922_v21 = vpop.f32.mrf.mxu2  ;;  %v1005_v22 = vpop.f32.mrf.mxu3 }
 0x118   : > { %1226 = vst.msk [vmem:[%s1846_s8 + $0x14] sm:$0xf] %vm1220_vm5, %v1217_v19  ;;  %v933_v23 = vadd.f32 %v922_v21, %v850_v20  ;;  %v841_v18 = vpop.f32.mrf.mxu1 }
 0x119   : > { %v851_v27 = vadd.f32 %v841_v18, %v657_v52 }
 0x11a   : > { %v1016_v25 = vadd.f32 %v1005_v22, %v933_v23  ;;  %v1201_v51 = vpop.f32.mrf.mxu0 }
 0x11c   : > { %v1210_v48 = vadd.f32 %v1199_v24, %v1016_v25 }
 0x11e   : > { %v1218_v26 = vpack.c.bf16 %v1210_v48, %v1210_v48 }
 0x11f   : > { %v924_v44 = vpop.f32.mrf.mxu2  ;;  %v1007_v49 = vpop.f32.mrf.mxu3 }
 0x120   : > { %1227 = vst.msk [vmem:[%s1846_s8 + $0x18] sm:$0xf] %vm1220_vm5, %v1218_v26  ;;  %v934_v29 = vadd.f32 %v924_v44, %v851_v27 }
 0x122   : > { %v1017_v30 = vadd.f32 %v1007_v49, %v934_v29 }
 0x124   : > { %v1211_v53 = vadd.f32 %v1201_v51, %v1017_v30 }
 0x126   : > { %v1219_v54 = vpack.c.bf16 %v1211_v53, %v1211_v53 }
 0x128   : > { %1228 = vst.msk [vmem:[%s1846_s8 + $0x1c] sm:$0xf] %vm1220_vm5, %v1219_v54 }
 0x129 PF: > { %s12_s9 = sadd.s32 1, %s1549_s9  }
 0x12a   : > { %p9_p4 = scmp.ge.s32.totalorder %s12_s9, 4  }
 0x12c   :  { %11 = sbr.rel (!%p9_p4) target bundleno = 1 (0x1), region = 71 }

// kernel: basic_block_pallas.3
= control target key start
LH: loop header
LB: loop body
LE: loop exit
PB: predicated region body
PF: predicated region fallthrough
CT: control target
= control target key end

     0   :  { %s1838_s15 = smov 0   ;;  %s2287_s0 = inlined_call_operand.vmem [shape: bf16[2,1,10,10,8], index: 0, kind: input, shape index: {}]   ;;  %s2288_s1 = inlined_call_operand.vmem [shape: bf16[9,8,8], index: 1, kind: input, shape index: {}]   ;;  %s2289_s2 = inlined_call_operand.vmem [shape: bf16[2,8,8,4], index: 2, kind: input, shape index: {}]   ;;  %s2290_s3 = inlined_call_operand.vmem [shape: bf16[4,8], index: 3, kind: input, shape index: {}]   ;;  %s2291_s4 = inlined_call_operand.vmem [shape: f32[2,64,8], index: 4, kind: output, shape index: {}]  }
   0x1 LB: > { %s1564_s16 = sadd.s32 4294967295, %s1811_s15   ;;  %p1568_p0 = scmp.ge.s32.totalorder %s1811_s15, 1  ;;  %s1811_s15 = sphi %s1838_s15, %s14_s15  }
   0x2   : > { %p172_p1 = scmp.lt.s32.totalorder %s1811_s15, 3 }
   0x4   : > { %p173_p2 = pnand %p1568_p0, %p172_p1 }
   0x5   : > { %p203_p3 = scmp.lt.s32.totalorder (!%p173_p2), %s1564_s16, 1 }
   0x6   : > { %176 = sbr.rel (%p173_p2) target bundleno = 313 (0x139), region = 36 }
   0xb   : > { %v227_v0 = vld [vmem:[%s2290_s3] sm:$0x3]  ;;  %vm336_vm0 = vcmask 1041408   ;;  %vm270_vm1 = vcmask 1043456   ;;  %v1614_v4 = vld [vmem:[%s2288_s1 + $0x4] sm:$0xf] }
   0xc   : > { %v236_v1 = vld [vmem:[%s2288_s1] sm:$0xf]  ;;  %v338_v2 = vsel %vm336_vm0, %v227_v0, 0  ;;  %v1627_v5 = vld [vmem:[%s2288_s1 + $0x8] sm:$0xf]  ;;  %s2297_s16 = smov (!%p203_p3, %s1564_s16), 1 }
   0xd   : > { %v272_v3 = vsel %vm270_vm1, %v236_v1, 0  ;;  %1795 = vmatpush.bf16.msra.mxu3 %v338_v2  ;;  %v1640_v6 = vld [vmem:[%s2288_s1 + $0xc] sm:$0xf]  ;;  %347 = vmatpush.bf16.msra.mxu1 %v338_v2  ;;  %v527_v7 = vsel %vm270_vm1, %v1614_v4, 0  ;;  %v652_v8 = vsel %vm270_vm1, %v1627_v5, 0  ;;  %s1796_s29 = smul.u32 80, %s2297_s16 }
   0xe   : > { %1794 = vmatpush.bf16.msra.mxu2 %v272_v3  ;;  %281 = vmatpush.bf16.msra.mxu0 %v272_v3  ;;  %v735_v9 = vsel %vm270_vm1, %v1640_v6, 0  ;;  %v1677_v10 = vld [vmem:[%s2288_s1 + $0x10] sm:$0xf]  ;;  %s1776_s30 = sshll.u32 %s2297_s16, 5  ;;  %vm323_vm2 = vcmask 31744   ;;  %vm257_vm3 = vcmask 64512  }
   0xf   : > { %v929_v11 = vsel %vm270_vm1, %v1677_v10, 0  ;;  %s1876_s7 = scalar_lea.vmem %s2289_s2, %s1776_s30  ;;  %s1881_s10 = scalar_lea.vmem %s2287_s0, %s1796_s29  ;;  %vm590_vm4 = vcmask 1042432   ;;  %v1698_v25 = vld [vmem:[%s2288_s1 + $0x14] sm:$0xf]  ;;  %vm385_vm5 = vsmask.f32 3328 }
  0x10   : > { %v1780_v12 = vld [vmem:[%s1876_s7 + $0x10] sm:$0xff]  ;;  %v1778_v13 = vld [vmem:[%s1876_s7] sm:$0xff]  ;;  %v1784_v15 = vld [vmem:[%s1881_s10 + $0x24] sm:$0xf0]  ;;  %vm386_vm6 = vsmask.f32 7440 }
  0x11   : > { %661 = vmatpush.bf16.msrb.mxu3 %v652_v8  ;;  %938 = vmatpush.bf16.msrb.mxu1 %v929_v11  ;;  %v1584_v14 = vld [vmem:[%s1881_s10 + $0x20] sm:$0xf]  ;;  %v1782_v18 = vld [vmem:[%s1881_s10 + $0x4] sm:$0xf0]  ;;  %v1896_v22 = vld [vmem:[%s1881_s10 + $0x30] sm:$0xf] }
  0x12   : > { %536 = vmatpush.bf16.msrb.mxu2 %v527_v7  ;;  %744 = vmatpush.bf16.msrb.mxu0 %v735_v9  ;;  %v1576_v16 = vld [vmem:[%s1881_s10] sm:$0xf]  ;;  %v1585_v17 = vor.u32 %v1784_v15, %v1584_v14  ;;  %v371_v21 = vld [vmem:[%s1881_s10 + $0x8] sm:$0xf]  ;;  %v1902_v26 = vld [vmem:[%s1881_s10 + $0x34] sm:$0xf0] }
  0x13   : > { %1612 = vmatmul.msk.bf16.vlgmr.msra.gmra.mxu3 %vm323_vm2, %v1780_v12  ;;  %1610 = vmatmul.msk.bf16.vlgmr.msra.gmra.mxu1 %vm323_vm2, %v1778_v13  ;;  %v1577_v19 = vor.u32 %v1782_v18, %v1576_v16  ;;  %v369_v20 = vld [vmem:[%s1881_s10] sm:$0xf]  ;;  %v1905_v27 = vld [vmem:[%s1881_s10 + $0x4] sm:$0x1]  ;;  %v403_v28 = vshrl.u32 %v371_v21, 16  ;;  %v406_v29 = vshll.u32 %v371_v21, 16  ;;  %v1589_v45 = vor.u32 %v1902_v26, %v1896_v22  ;;  %vm1955_vm9 = vmor %vm385_vm5, %vm386_vm6 }
  0x14   : > { %1592 = vmatmul.msk.bf16.vlgmr.msra.gmra.mxu2 %vm257_vm3, %v1585_v17  ;;  %v389_v23 = vshrl.u32 %v369_v20, 16  ;;  %v392_v24 = vshll.u32 %v369_v20, 16  ;;  %v1908_v30 = vld [vmem:[%s1881_s10 + $0xc] sm:$0x1]  ;;  %vm591_vm7 = vcmask 1046532   ;;  %v1051_v38 = vsel %vm270_vm1, %v1698_v25, 0 }
  0x15   : > { %1590 = vmatmul.msk.bf16.vlgmr.msra.gmra.mxu0 %vm257_vm3, %v1577_v19  ;;  %v1711_v32 = vld [vmem:[%s2288_s1 + $0x18] sm:$0xf]  ;;  %v1580_v33 = vld [vmem:[%s1881_s10 + $0x10] sm:$0xf]  ;;  %v405_v36 = vrot.slane %v403_v28, 4  ;;  %v408_v37 = vrot.slane %v406_v29, 5  ;;  %vm1949_vm8 = vmor %vm590_vm4, %vm591_vm7 }
  0x16   : > { %v391_v31 = vrot.slane %v389_v23, 4  ;;  %v1783_v34 = vld [vmem:[%s1881_s10 + $0x14] sm:$0xf0]  ;;  %v394_v35 = vrot.slane %v392_v24, 5  ;;  %v1661_v39 = vld [vmem:[%s1881_s10 + $0x8] sm:$0xf]  ;;  %1060 = vmatpush.bf16.msra.mxu2 %v1051_v38 }
  0x17   : > { %v566_v40 = vld [vmem:[%s1881_s10] sm:$0xe]  ;;  %v1134_v41 = vsel %vm270_vm1, %v1711_v32, 0  ;;  %v1663_v42 = vld [vmem:[%s1881_s10 + $0x10] sm:$0xf]  ;;  %v791_v43 = vshrl.u32 %v1661_v39, 16  ;;  %v409_v57 = vor.u32 %v408_v37, %v405_v36  ;;  %v1581_v62 = vor.u32 %v1783_v34, %v1580_v33 }
  0x18   : > { %v1781_v44 = vld [vmem:[%s1876_s7 + $0x18] sm:$0xff]  ;;  %v1779_v46 = vld [vmem:[%s1876_s7 + $0x8] sm:$0xff]  ;;  %1143 = vmatpush.bf16.msra.mxu3 %v1134_v41  ;;  %v1928_v48 = vld [vmem:[%s1881_s10 + $0x14] sm:$0x1]  ;;  %v794_v49 = vshll.u32 %v1661_v39, 16  ;;  %v805_v50 = vshrl.u32 %v1663_v42, 16  ;;  %v395_v56 = vor.u32 %v394_v35, %v391_v31 }
  0x19   : > { %v1925_v47 = vld [vmem:[%s1881_s10 + $0xc] sm:$0x1]  ;;  %v567_v51 = vld [vmem:[%s1881_s10 + $0x8] sm:$0xe]  ;;  %v398_v52 = vshll.u32 %v1905_v27, 16  ;;  %v412_v53 = vshll.u32 %v1908_v30, 16 }
  0x1a   : > { %v793_v54 = vrot.slane %v791_v43, 4  ;;  %v808_v55 = vshll.u32 %v1663_v42, 16  ;;  %v796_v58 = vrot.slane %v794_v49, 5  ;;  %v807_v59 = vrot.slane %v805_v50, 4  ;;  %v1748_v60 = vld [vmem:[%s2288_s1 + $0x1c] sm:$0xf] }
  0x1b   : > { %v1769_v61 = vld [vmem:[%s2288_s1 + $0x20] sm:$0xf]  ;;  %v800_v63 = vshll.u32 %v1925_v47, 16  ;;  %v814_v1 = vshll.u32 %v1928_v48, 16  ;;  %v1619_v2 = vrot.slane %v566_v40, 9  ;;  %v595_v3 = vrot.slane %v1905_v27, 5 }
  0x1c   : > { %v810_v0 = vrot.slane %v808_v55, 5  ;;  %v599_v4 = vrot.slane %v1908_v30, 5  ;;  %v797_v5 = vor.u32 %v796_v58, %v793_v54  ;;  %v1620_v6 = vrot.slane %v567_v51, 9  ;;  %v373_v20 = vld [vmem:[%s1881_s10 + $0x10] sm:$0xf]  ;;  %s1777_s21 = sshll.u32 %s2297_s16, 6 }
  0x1d   : > { %v1328_v8 = vsel %vm270_vm1, %v1748_v60, 0  ;;  %v1450_v9 = vsel %vm270_vm1, %v1769_v61, 0  ;;  %v396_v11 = vrot.slane %v395_v56, 4  ;;  %v400_v12 = vrot.slane %v398_v52, 5  ;;  %v375_v22 = vld [vmem:[%s1881_s10 + $0x18] sm:$0xf]  ;;  %s2248_s24 = scalar_lea.vmem %s2291_s4, %s1777_s21 }
  0x1e   : > { %v811_v7 = vor.u32 %v810_v0, %v807_v59  ;;  %v410_v13 = vrot.slane %v409_v57, 4  ;;  %v414_v14 = vrot.slane %v412_v53, 5  ;;  %v798_v16 = vrot.slane %v797_v5, 4  ;;  %1337 = vmatpush.bf16.msra.mxu0 %v1328_v8  ;;  %1459 = vmatpush.bf16.msra.mxu1 %v1450_v9  ;;  %v1665_v26 = vld [vmem:[%s1881_s10 + $0x18] sm:$0xf] }
  0x1f   : > { %v802_v17 = vrot.slane %v800_v63, 5  ;;  %v816_v19 = vrot.slane %v814_v1, 5  ;;  %v596_v21 = vsel %vm1949_vm8, %v1619_v2, %v595_v3  ;;  %v600_v23 = vsel %vm1949_vm8, %v1620_v6, %v599_v4  ;;  %v1667_v31 = vld [vmem:[%s1881_s10 + $0x20] sm:$0xf]  ;;  %v374_v38 = vld [vmem:[%s1881_s10 + $0x14] sm:$0x1] }
  0x20   : > { %v812_v18 = vrot.slane %v811_v7, 4  ;;  %v401_v24 = vsel %vm1955_vm9, %v396_v11, %v400_v12  ;;  %v415_v25 = vsel %vm1955_vm9, %v410_v13, %v414_v14  ;;  %v417_v29 = vshrl.u32 %v373_v20, 16  ;;  %v376_v42 = vld [vmem:[%s1881_s10 + $0x1c] sm:$0x1]  ;;  %v568_v43 = vld [vmem:[%s1881_s10 + $0x10] sm:$0xe] }
  0x21   : > { %v803_v27 = vsel %vm1955_vm9, %v798_v16, %v802_v17  ;;  %v420_v30 = vshll.u32 %v373_v20, 16  ;;  %v627_v32 = vunpack.c.l.b16 %v596_v21  ;;  %v431_v33 = vshrl.u32 %v375_v22, 16  ;;  %v1981_v50 = vld [vmem:[%s1881_s10 + $0x1c] sm:$0x1]  ;;  %v1984_v55 = vld [vmem:[%s1881_s10 + $0x24] sm:$0x1] }
  0x22   : > { %v817_v28 = vsel %vm1955_vm9, %v812_v18, %v816_v19  ;;  %v434_v34 = vshll.u32 %v375_v22, 16  ;;  %v628_v35 = vunpack.c.l.b16 %v600_v23  ;;  %v502_v36 = vunpack.c.l.b16 %v401_v24  ;;  %v1643_v59 = vld [vmem:[%s1881_s10 + $0x8] sm:$0xf]  ;;  %v569_v0 = vld [vmem:[%s1881_s10 + $0x18] sm:$0xe] }
  0x23   : > { %1613 = vmatmul.msk.bf16.gmra.mxu3 %vm323_vm2, %v1781_v44  ;;  %1611 = vmatmul.msk.bf16.gmra.mxu1 %vm323_vm2, %v1779_v46  ;;  %v503_v37 = vunpack.c.l.b16 %v415_v25  ;;  %v819_v39 = vshrl.u32 %v1665_v26, 16  ;;  %v904_v40 = vunpack.c.l.b16 %v803_v27  ;;  %v905_v41 = vunpack.c.l.b16 %v817_v28  ;;  %v1669_v25 = vld [vmem:[%s1881_s10 + $0x28] sm:$0xf] }
  0x24   : > { %1593 = vmatmul.msk.bf16.gmra.mxu2 %vm257_vm3, %v1589_v45  ;;  %v822_v44 = vshll.u32 %v1665_v26, 16  ;;  %v833_v45 = vshrl.u32 %v1667_v31, 16  ;;  %v419_v46 = vrot.slane %v417_v29, 4  ;;  %v422_v49 = vrot.slane %v420_v30, 5  ;;  %v1671_v26 = vld [vmem:[%s1881_s10 + $0x30] sm:$0xf] }
  0x25   : > { %1591 = vmatmul.msk.bf16.gmra.mxu0 %vm257_vm3, %v1581_v62  ;;  %v821_v51 = vrot.slane %v819_v39, 4  ;;  %v836_v52 = vshll.u32 %v1667_v31, 16  ;;  %v433_v53 = vrot.slane %v431_v33, 4  ;;  %v436_v54 = vrot.slane %v434_v34, 5  ;;  %v1786_v62 = vld [vmem:[%s1881_s10 + $0xc] sm:$0xf0] }
  0x26   : > { %v824_v56 = vrot.slane %v822_v44, 5  ;;  %v835_v57 = vrot.slane %v833_v45, 4  ;;  %v635_v58 = vpack.c.b16 %v628_v35, %v627_v32  ;;  %v1621_v60 = vrot.slane %v568_v43, 9  ;;  %v377_v30 = vld [vmem:[%s1881_s10 + $0x20] sm:$0xf] }
  0x27   : > { %v838_v61 = vrot.slane %v836_v52, 5  ;;  %v912_v63 = vpack.c.b16 %v905_v41, %v904_v40  ;;  %v603_v1 = vrot.slane %v374_v38, 5  ;;  %v828_v3 = vshll.u32 %v1981_v50, 16  ;;  %v379_v31 = vld [vmem:[%s1881_s10 + $0x28] sm:$0xf] }
  0x28   : > { %v825_v2 = vor.u32 %v824_v56, %v821_v51  ;;  %v426_v4 = vshll.u32 %v374_v38, 16  ;;  %v440_v5 = vshll.u32 %v376_v42, 16  ;;  %v842_v7 = vshll.u32 %v1984_v55, 16  ;;  %v570_v40 = vld [vmem:[%s1881_s10 + $0x20] sm:$0xe] }
  0x29   : > { %v839_v6 = vor.u32 %v838_v61, %v835_v57  ;;  %v510_v8 = vpack.c.b16 %v503_v37, %v502_v36  ;;  %v423_v9 = vor.u32 %v422_v49, %v419_v46  ;;  %v437_v11 = vor.u32 %v436_v54, %v433_v53  ;;  %v378_v49 = vld [vmem:[%s1881_s10 + $0x24] sm:$0x1]  ;;  %v380_v51 = vld [vmem:[%s1881_s10 + $0x2c] sm:$0x1]  ;;  %v1647_v52 = vld [vmem:[%s1881_s10 + $0x18] sm:$0xf] }
  0x2a   : > { %v1644_v12 = vor.u32 %v1786_v62, %v1643_v59  ;;  %v1622_v13 = vrot.slane %v569_v0, 9  ;;  %v607_v14 = vrot.slane %v376_v42, 5  ;;  %v604_v16 = vsel %vm1949_vm8, %v1621_v60, %v603_v1  ;;  %v571_v53 = vld [vmem:[%s1881_s10 + $0x28] sm:$0xe]  ;;  %v2020_v0 = vld [vmem:[%s1881_s10 + $0x34] sm:$0x1] }
  0x2b   : > { %v826_v17 = vrot.slane %v825_v2, 4  ;;  %v830_v18 = vrot.slane %v828_v3, 5  ;;  %v428_v19 = vrot.slane %v426_v4, 5  ;;  %v442_v20 = vrot.slane %v440_v5, 5  ;;  %v1787_v1 = vld [vmem:[%s1881_s10 + $0x1c] sm:$0xf0] }
  0x2c   : > { %v840_v21 = vrot.slane %v839_v6, 4  ;;  %v844_v22 = vrot.slane %v842_v7, 5  ;;  %v424_v23 = vrot.slane %v423_v9, 4  ;;  %v438_v24 = vrot.slane %v437_v11, 4 }
  0x2d   : > { %v608_v27 = vsel %vm1949_vm8, %v1622_v13, %v607_v14  ;;  %v629_v28 = vunpack.c.l.b16 %v604_v16  ;;  %v831_v29 = vsel %vm1955_vm9, %v826_v17, %v830_v18  ;;  %v847_v33 = vshrl.u32 %v1669_v25, 16 }
  0x2e   : > { %v845_v32 = vsel %vm1955_vm9, %v840_v21, %v844_v22  ;;  %v850_v34 = vshll.u32 %v1669_v25, 16  ;;  %v861_v35 = vshrl.u32 %v1671_v26, 16  ;;  %v630_v36 = vunpack.c.l.b16 %v608_v27 }
  0x2f   : > { %v429_v37 = vsel %vm1955_vm9, %v424_v23, %v428_v19  ;;  %v443_v38 = vsel %vm1955_vm9, %v438_v24, %v442_v20  ;;  %v864_v39 = vshll.u32 %v1671_v26, 16  ;;  %v445_v41 = vshrl.u32 %v377_v30, 16 }
  0x30   : > { %v448_v42 = vshll.u32 %v377_v30, 16  ;;  %v459_v43 = vshrl.u32 %v379_v31, 16  ;;  %v462_v44 = vshll.u32 %v379_v31, 16  ;;  %v906_v45 = vunpack.c.l.b16 %v831_v29  ;;  %v1675_v29 = vld [vmem:[%s1881_s10 + $0x40] sm:$0xf] }
  0x31   : > { %v907_v46 = vunpack.c.l.b16 %v845_v32  ;;  %v849_v54 = vrot.slane %v847_v33, 4  ;;  %v852_v56 = vrot.slane %v850_v34, 5  ;;  %v863_v57 = vrot.slane %v861_v35, 4  ;;  %v381_v34 = vld [vmem:[%s1881_s10 + $0x30] sm:$0xf] }
  0x32   : > { %v636_v59 = vpack.c.b16 %v630_v36, %v629_v28  ;;  %v504_v60 = vunpack.c.l.b16 %v429_v37  ;;  %v505_v61 = vunpack.c.l.b16 %v443_v38  ;;  %v1623_v62 = vrot.slane %v570_v40, 9  ;;  %v1673_v28 = vld [vmem:[%s1881_s10 + $0x38] sm:$0xf] }
  0x33   : > { %1628 = vmatmul.msk.bf16.vlgmr.msrb.gmra.mxu3 %vm257_vm3, %v635_v58  ;;  %1678 = vmatmul.msk.bf16.vlgmr.msrb.gmra.mxu1 %vm257_vm3, %v912_v63  ;;  %v866_v58 = vrot.slane %v864_v39, 5  ;;  %v2017_v63 = vld [vmem:[%s1881_s10 + $0x2c] sm:$0x1]  ;;  %v447_v2 = vrot.slane %v445_v41, 4  ;;  %v450_v3 = vrot.slane %v448_v42, 5  ;;  %v461_v4 = vrot.slane %v459_v43, 4 }
  0x34   : > { %1615 = vmatmul.msk.bf16.vlgmr.msrb.gmra.mxu2 %vm257_vm3, %v510_v8  ;;  %v464_v5 = vrot.slane %v462_v44, 5  ;;  %v913_v6 = vpack.c.b16 %v907_v46, %v906_v45  ;;  %v611_v7 = vrot.slane %v378_v49, 5  ;;  %v1624_v8 = vrot.slane %v571_v53, 9  ;;  %v383_v37 = vld [vmem:[%s1881_s10 + $0x38] sm:$0xf] }
  0x35   : > { %1657 = vmatmul.msk.bf16.vlgmr.msrb.gmra.mxu0 %vm257_vm3, %v1644_v12  ;;  %v615_v9 = vrot.slane %v380_v51, 5  ;;  %v853_v11 = vor.u32 %v852_v56, %v849_v54  ;;  %v856_v12 = vshll.u32 %v2017_v63, 16  ;;  %v867_v13 = vor.u32 %v866_v58, %v863_v57  ;;  %v1651_v56 = vld [vmem:[%s1881_s10 + $0x28] sm:$0xf]  ;;  %v1788_v57 = vld [vmem:[%s1881_s10 + $0x2c] sm:$0xf0] }
  0x36   : > { %v870_v14 = vshll.u32 %v2020_v0, 16  ;;  %v511_v16 = vpack.c.b16 %v505_v61, %v504_v60  ;;  %v1648_v17 = vor.u32 %v1787_v1, %v1647_v52  ;;  %v451_v18 = vor.u32 %v450_v3, %v447_v2  ;;  %v2050_v61 = vld [vmem:[%s1881_s10 + $0x3c] sm:$0x1] }
  0x37   : > { %v454_v19 = vshll.u32 %v378_v49, 16  ;;  %v465_v20 = vor.u32 %v464_v5, %v461_v4  ;;  %v468_v21 = vshll.u32 %v380_v51, 16  ;;  %v612_v22 = vsel %vm1949_vm8, %v1623_v62, %v611_v7  ;;  %v2053_v62 = vld [vmem:[%s1881_s10 + $0x44] sm:$0x1]  ;;  %v1682_v7 = vld [vmem:[%s1881_s10 + $0x8] sm:$0xe] }
  0x38   : > { %v616_v23 = vsel %vm1949_vm8, %v1624_v8, %v615_v9  ;;  %v854_v24 = vrot.slane %v853_v11, 4  ;;  %v858_v25 = vrot.slane %v856_v12, 5  ;;  %v868_v26 = vrot.slane %v867_v13, 4  ;;  %v1683_v8 = vld [vmem:[%s1881_s10 + $0x10] sm:$0xe] }
  0x39   : > { %v872_v27 = vrot.slane %v870_v14, 5  ;;  %v452_v30 = vrot.slane %v451_v18, 4  ;;  %v456_v31 = vrot.slane %v454_v19, 5  ;;  %v466_v32 = vrot.slane %v465_v20, 4  ;;  %v572_v9 = vld [vmem:[%s1881_s10 + $0x30] sm:$0xe] }
  0x3a   : > { %v470_v33 = vrot.slane %v468_v21, 5  ;;  %v631_v35 = vunpack.c.l.b16 %v612_v22  ;;  %v632_v36 = vunpack.c.l.b16 %v616_v23  ;;  %v875_v38 = vshrl.u32 %v1673_v28, 16  ;;  %v382_v18 = vld [vmem:[%s1881_s10 + $0x34] sm:$0x1]  ;;  %v384_v19 = vld [vmem:[%s1881_s10 + $0x3c] sm:$0x1] }
  0x3b   : > { %v878_v39 = vshll.u32 %v1673_v28, 16  ;;  %v859_v40 = vsel %vm1955_vm9, %v854_v24, %v858_v25  ;;  %v873_v41 = vsel %vm1955_vm9, %v868_v26, %v872_v27  ;;  %v889_v42 = vshrl.u32 %v1675_v29, 16  ;;  %v573_v22 = vld [vmem:[%s1881_s10 + $0x38] sm:$0xe] }
  0x3c   : > { %v892_v43 = vshll.u32 %v1675_v29, 16  ;;  %v994_v44 = vrot.slane %v1925_v47, 5  ;;  %v998_v45 = vrot.slane %v1928_v48, 5  ;;  %v473_v46 = vshrl.u32 %v381_v34, 16 }
  0x3d   : > { %v476_v49 = vshll.u32 %v381_v34, 16  ;;  %v457_v51 = vsel %vm1955_vm9, %v452_v30, %v456_v31  ;;  %v471_v52 = vsel %vm1955_vm9, %v466_v32, %v470_v33  ;;  %v487_v53 = vshrl.u32 %v383_v37, 16 }
  0x3e   : > { %v490_v54 = vshll.u32 %v383_v37, 16  ;;  %v908_v58 = vunpack.c.l.b16 %v859_v40  ;;  %v909_v47 = vunpack.c.l.b16 %v873_v41  ;;  %v880_v60 = vrot.slane %v878_v39, 5 }
  0x3f   : > { %v637_v48 = vpack.c.b16 %v632_v36, %v631_v35  ;;  %v891_v1 = vrot.slane %v889_v42, 4  ;;  %v894_v2 = vrot.slane %v892_v43, 5  ;;  %v506_v3 = vunpack.c.l.b16 %v457_v51  ;;  %v1732_v43 = vld [vmem:[%s1881_s10 + $0x10] sm:$0xf]  ;;  %v1734_v51 = vld [vmem:[%s1881_s10 + $0x18] sm:$0xf] }
  0x40   : > { %v507_v4 = vunpack.c.l.b16 %v471_v52  ;;  %v475_v5 = vrot.slane %v473_v46, 4  ;;  %v489_v11 = vrot.slane %v487_v53, 4  ;;  %v492_v12 = vrot.slane %v490_v54, 5 }
  0x41   : > { %v1690_v13 = vrot.slane %v1682_v7, 9  ;;  %v1691_v14 = vrot.slane %v1683_v8, 9  ;;  %v884_v21 = vshll.u32 %v2050_v61, 16  ;;  %v895_v23 = vor.u32 %v894_v2, %v891_v1 }
  0x42   : > { %v898_v24 = vshll.u32 %v2053_v62, 16  ;;  %v512_v27 = vpack.c.b16 %v507_v4, %v506_v3  ;;  %v1625_v28 = vrot.slane %v572_v9, 9  ;;  %v482_v32 = vshll.u32 %v382_v18, 16 }
  0x43   : > { %1629 = vmatmul.msk.bf16.gmra.mxu3 %vm257_vm3, %v636_v59  ;;  %1679 = vmatmul.msk.bf16.gmra.mxu1 %vm257_vm3, %v913_v6  ;;  %v877_v59 = vrot.slane %v875_v38, 4  ;;  %v478_v6 = vrot.slane %v476_v49, 5  ;;  %v995_v25 = vsel %vm1949_vm8, %v1690_v13, %v994_v44  ;;  %v999_v26 = vsel %vm1949_vm8, %v1691_v14, %v998_v45  ;;  %v1684_v13 = vld [vmem:[%s1881_s10 + $0x18] sm:$0xe]  ;;  %v1685_v14 = vld [vmem:[%s1881_s10 + $0x20] sm:$0xe] }
  0x44   : > { %1616 = vmatmul.msk.bf16.gmra.mxu2 %vm257_vm3, %v511_v16  ;;  %v1652_v16 = vor.u32 %v1788_v57, %v1651_v56  ;;  %v1026_v29 = vunpack.c.l.b16 %v995_v25  ;;  %v1027_v30 = vunpack.c.l.b16 %v999_v26  ;;  %v493_v33 = vor.u32 %v492_v12, %v489_v11 }
  0x45   : > { %1658 = vmatmul.msk.bf16.gmra.mxu0 %vm257_vm3, %v1648_v17  ;;  %v914_v17 = vpack.c.b16 %v909_v47, %v908_v58  ;;  %v881_v20 = vor.u32 %v880_v60, %v877_v59  ;;  %v479_v31 = vor.u32 %v478_v6, %v475_v5  ;;  %v496_v34 = vshll.u32 %v384_v19, 16  ;;  %v1655_v5 = vld [vmem:[%s1881_s10 + $0x38] sm:$0xf] }
  0x46   : > { %v619_v35 = vrot.slane %v382_v18, 5  ;;  %v1626_v36 = vrot.slane %v573_v22, 9  ;;  %v623_v37 = vrot.slane %v384_v19, 5  ;;  %v2069_v38 = vpack.c.b16 %v1027_v30, %v1026_v29  ;;  %v1753_v29 = vld [vmem:[%s1881_s10 + $0x10] sm:$0xe] }
  0x47   : > { %v882_v39 = vrot.slane %v881_v20, 4  ;;  %v886_v40 = vrot.slane %v884_v21, 5  ;;  %v896_v41 = vrot.slane %v895_v23, 4  ;;  %v900_v42 = vrot.slane %v898_v24, 5  ;;  %v1733_v23 = vld [vmem:[%s1881_s10 + $0x14] sm:$0x1] }
  0x48   : > { %v480_v44 = vrot.slane %v479_v31, 4  ;;  %v484_v45 = vrot.slane %v482_v32, 5  ;;  %v494_v46 = vrot.slane %v493_v33, 4  ;;  %v498_v49 = vrot.slane %v496_v34, 5  ;;  %v1735_v24 = vld [vmem:[%s1881_s10 + $0x1c] sm:$0x1] }
  0x49   : > { %v620_v52 = vsel %vm1949_vm8, %v1625_v28, %v619_v35  ;;  %v624_v53 = vsel %vm1949_vm8, %v1626_v36, %v623_v37  ;;  %v887_v54 = vsel %vm1955_vm9, %v882_v39, %v886_v40  ;;  %v901_v56 = vsel %vm1955_vm9, %v896_v41, %v900_v42  ;;  %v1754_v30 = vld [vmem:[%s1881_s10 + $0x18] sm:$0xe]  ;;  %v1736_v41 = vld [vmem:[%s1881_s10 + $0x20] sm:$0xf] }
  0x4a   : > { %v1190_v57 = vshrl.u32 %v1732_v43, 16  ;;  %v1193_v58 = vshll.u32 %v1732_v43, 16  ;;  %v1204_v47 = vshrl.u32 %v1734_v51, 16  ;;  %v1207_v59 = vshll.u32 %v1734_v51, 16 }
  0x4b   : > { %v485_v60 = vsel %vm1955_vm9, %v480_v44, %v484_v45  ;;  %v633_v1 = vunpack.c.l.b16 %v620_v52  ;;  %v634_v2 = vunpack.c.l.b16 %v624_v53  ;;  %v910_v3 = vunpack.c.l.b16 %v887_v54 }
  0x4c   : > { %v911_v4 = vunpack.c.l.b16 %v901_v56  ;;  %v1192_v6 = vrot.slane %v1190_v57, 4  ;;  %v1195_v7 = vrot.slane %v1193_v58, 5  ;;  %v508_v8 = vunpack.c.l.b16 %v485_v60  ;;  %v1714_v60 = vld [vmem:[%s1881_s10 + $0x10] sm:$0xf] }
  0x4d   : > { %v1206_v11 = vrot.slane %v1204_v47, 4  ;;  %v1209_v12 = vrot.slane %v1207_v59, 5  ;;  %v1002_v18 = vrot.slane %v1981_v50, 5  ;;  %v1693_v19 = vrot.slane %v1685_v14, 9 }
  0x4e   : > { %v1006_v20 = vrot.slane %v1984_v55, 5  ;;  %v638_v21 = vpack.c.b16 %v634_v2, %v633_v1  ;;  %v915_v22 = vpack.c.b16 %v911_v4, %v910_v3  ;;  %v1196_v32 = vor.u32 %v1195_v7, %v1192_v6  ;;  %v1686_v7 = vld [vmem:[%s1881_s10 + $0x28] sm:$0xe] }
  0x4f   : > { %v1199_v33 = vshll.u32 %v1733_v23, 16  ;;  %v1210_v55 = vor.u32 %v1209_v12, %v1206_v11  ;;  %v1213_v34 = vshll.u32 %v1735_v24, 16  ;;  %v1761_v36 = vrot.slane %v1753_v29, 9 }
  0x50   : > { %v1007_v26 = vsel %vm1949_vm8, %v1693_v19, %v1006_v20  ;;  %v1393_v37 = vrot.slane %v1733_v23, 5  ;;  %v1762_v39 = vrot.slane %v1754_v30, 9  ;;  %v1397_v40 = vrot.slane %v1735_v24, 5  ;;  %v1756_v23 = vld [vmem:[%s1881_s10 + $0x28] sm:$0xe] }
  0x51   : > { %v1029_v50 = vunpack.c.l.b16 %v1007_v26  ;;  %v1197_v42 = vrot.slane %v1196_v32, 4  ;;  %v1201_v43 = vrot.slane %v1199_v33, 5  ;;  %v1211_v44 = vrot.slane %v1210_v55, 4  ;;  %v1740_v32 = vld [vmem:[%s1881_s10 + $0x30] sm:$0xf] }
  0x52   : > { %v1215_v45 = vrot.slane %v1213_v34, 5  ;;  %v1398_v51 = vsel %vm1949_vm8, %v1762_v39, %v1397_v40  ;;  %v1218_v52 = vshrl.u32 %v1736_v41, 16  ;;  %v1221_v53 = vshll.u32 %v1736_v41, 16 }
  0x53   : > { %1630 = vmatmul.msk.bf16.gmra.mxu3 %vm257_vm3, %v637_v48  ;;  %1680 = vmatmul.msk.bf16.gmra.mxu1 %vm257_vm3, %v914_v17  ;;  %v499_v48 = vsel %vm1955_vm9, %v494_v46, %v498_v49  ;;  %v1692_v17 = vrot.slane %v1684_v13, 9  ;;  %v1738_v46 = vld [vmem:[%s1881_s10 + $0x28] sm:$0xf]  ;;  %v1394_v49 = vsel %vm1949_vm8, %v1761_v36, %v1393_v37  ;;  %v1202_v57 = vsel %vm1955_vm9, %v1197_v42, %v1201_v43  ;;  %v1742_v37 = vld [vmem:[%s1881_s10 + $0x38] sm:$0xf] }
  0x54   : > { %1617 = vmatmul.msk.bf16.gmra.mxu2 %vm257_vm3, %v512_v27  ;;  %v509_v9 = vunpack.c.l.b16 %v499_v48  ;;  %v1232_v54 = vshrl.u32 %v1738_v46, 16  ;;  %v1235_v56 = vshll.u32 %v1738_v46, 16  ;;  %v1216_v58 = vsel %vm1955_vm9, %v1211_v44, %v1215_v45  ;;  %v1790_v48 = vld [vmem:[%s1881_s10 + $0x14] sm:$0xf0] }
  0x55   : > { %1659 = vmatmul.msk.bf16.gmra.mxu0 %vm257_vm3, %v1652_v16  ;;  %v1789_v16 = vld [vmem:[%s1881_s10 + $0x3c] sm:$0xf0]  ;;  %v1003_v25 = vsel %vm1949_vm8, %v1692_v17, %v1002_v18  ;;  %v1425_v47 = vunpack.c.l.b16 %v1394_v49  ;;  %v1426_v59 = vunpack.c.l.b16 %v1398_v51  ;;  %v1220_v1 = vrot.slane %v1218_v52, 4  ;;  %v1737_v17 = vld [vmem:[%s1881_s10 + $0x24] sm:$0x1] }
  0x56   : > { %v513_v27 = vpack.c.b16 %v509_v9, %v508_v8  ;;  %v1656_v28 = vor.u32 %v1789_v16, %v1655_v5  ;;  %v1028_v31 = vunpack.c.l.b16 %v1003_v25  ;;  %v1223_v2 = vrot.slane %v1221_v53, 5  ;;  %v1687_v8 = vld [vmem:[%s1881_s10 + $0x30] sm:$0xe]  ;;  %v1739_v18 = vld [vmem:[%s1881_s10 + $0x2c] sm:$0x1] }
  0x57   : > { %v1303_v3 = vunpack.c.l.b16 %v1202_v57  ;;  %v1304_v4 = vunpack.c.l.b16 %v1216_v58  ;;  %v1234_v5 = vrot.slane %v1232_v54, 4  ;;  %v1237_v6 = vrot.slane %v1235_v56, 5  ;;  %v1718_v51 = vld [vmem:[%s1881_s10 + $0x20] sm:$0xf]  ;;  %v1791_v52 = vld [vmem:[%s1881_s10 + $0x24] sm:$0xf0] }
  0x58   : > { %v2103_v35 = vpack.c.b16 %v1029_v50, %v1028_v31  ;;  %v1694_v9 = vrot.slane %v1686_v7, 9  ;;  %v1010_v11 = vrot.slane %v2017_v63, 5  ;;  %v1695_v12 = vrot.slane %v1687_v8, 9  ;;  %v1743_v7 = vld [vmem:[%s1881_s10 + $0x3c] sm:$0x1] }
  0x59   : > { %v1014_v13 = vrot.slane %v2020_v0, 5  ;;  %v1715_v14 = vor.u32 %v1790_v48, %v1714_v60  ;;  %v1433_v16 = vpack.c.b16 %v1426_v59, %v1425_v47  ;;  %v1224_v63 = vor.u32 %v1223_v2, %v1220_v1  ;;  %v1688_v59 = vld [vmem:[%s1881_s10 + $0x38] sm:$0xe]  ;;  %v1689_v60 = vld [vmem:[%s1881_s10 + $0x40] sm:$0xe] }
  0x5a   : > { %v1011_v19 = vsel %vm1949_vm8, %v1694_v9, %v1010_v11  ;;  %v1227_v26 = vshll.u32 %v1737_v17, 16  ;;  %v1241_v0 = vshll.u32 %v1739_v18, 16  ;;  %v1401_v30 = vrot.slane %v1737_v17, 5 }
  0x5b   : > { %v1015_v20 = vsel %vm1949_vm8, %v1695_v12, %v1014_v13  ;;  %v1030_v24 = vunpack.c.l.b16 %v1011_v19  ;;  %v1764_v31 = vrot.slane %v1756_v23, 9  ;;  %v1405_v50 = vrot.slane %v1739_v18, 5  ;;  %v1757_v12 = vld [vmem:[%s1881_s10 + $0x30] sm:$0xe]  ;;  %v1758_v13 = vld [vmem:[%s1881_s10 + $0x38] sm:$0xe] }
  0x5c   : > { %v1031_v25 = vunpack.c.l.b16 %v1015_v20  ;;  %v1225_v33 = vrot.slane %v1224_v63, 4  ;;  %v1229_v55 = vrot.slane %v1227_v26, 5  ;;  %v1243_v36 = vrot.slane %v1241_v0, 5 }
  0x5d   : > { %v1406_v40 = vsel %vm1949_vm8, %v1764_v31, %v1405_v50  ;;  %v1246_v41 = vshrl.u32 %v1740_v32, 16  ;;  %v1249_v42 = vshll.u32 %v1740_v32, 16  ;;  %v1263_v43 = vshll.u32 %v1742_v37, 16 }
  0x5e   : > { %v1230_v44 = vsel %vm1955_vm9, %v1225_v33, %v1229_v55  ;;  %v1428_v49 = vunpack.c.l.b16 %v1406_v40  ;;  %v1696_v48 = vrot.slane %v1688_v59, 9  ;;  %v1018_v1 = vrot.slane %v2050_v61, 5 }
  0x5f   : > { %v1248_v53 = vrot.slane %v1246_v41, 4  ;;  %v1251_v54 = vrot.slane %v1249_v42, 5  ;;  %v1305_v56 = vunpack.c.l.b16 %v1230_v44  ;;  %v1265_v47 = vrot.slane %v1263_v43, 5 }
  0x60   : > { %v1697_v2 = vrot.slane %v1689_v60, 9  ;;  %v1019_v8 = vsel %vm1949_vm8, %v1696_v48, %v1018_v1  ;;  %v1765_v20 = vrot.slane %v1757_v12, 9  ;;  %v1413_v23 = vrot.slane %v1743_v7, 5 }
  0x61   : > { %v1252_v17 = vor.u32 %v1251_v54, %v1248_v53  ;;  %v1759_v53 = vld [vmem:[%s1881_s10 + $0x40] sm:$0xe]  ;;  %v1760_v54 = vld [vmem:[%s1881_s10 + $0x48] sm:$0xe] }
  0x62   : > { %v1767_v48 = vrot.slane %v1759_v53, 9 }
  0x63   : > { %1631 = vmatmul.msk.bf16.gmra.mxu3 %vm257_vm3, %v638_v21  ;;  %1681 = vmatmul.msk.bf16.gmra.mxu1 %vm257_vm3, %v915_v22  ;;  %v1311_v21 = vpack.c.b16 %v1304_v4, %v1303_v3  ;;  %v1755_v22 = vld [vmem:[%s1881_s10 + $0x20] sm:$0xe]  ;;  %v1022_v3 = vrot.slane %v2053_v62, 5  ;;  %v1719_v4 = vor.u32 %v1791_v52, %v1718_v51  ;;  %v1269_v62 = vshll.u32 %v1743_v7, 16  ;;  %v1745_v51 = vld [vmem:[%s1881_s10 + $0x44] sm:$0x1] }
  0x64   : > { %1618 = vmatmul.msk.bf16.gmra.mxu2 %vm257_vm3, %v513_v27  ;;  %v1238_v27 = vor.u32 %v1237_v6, %v1234_v5  ;;  %v1763_v29 = vrot.slane %v1755_v22, 9  ;;  %v1741_v6 = vld [vmem:[%s1881_s10 + $0x34] sm:$0x1]  ;;  %v1766_v22 = vrot.slane %v1758_v13, 9  ;;  %v1747_v52 = vld [vmem:[%s1881_s10 + $0x4c] sm:$0x1] }
  0x65   : > { %1660 = vmatmul.msk.bf16.gmra.mxu0 %vm257_vm3, %v1656_v28  ;;  %v2133_v28 = vpack.c.b16 %v1031_v25, %v1030_v24  ;;  %v1023_v9 = vsel %vm1949_vm8, %v1697_v2, %v1022_v3  ;;  %v1255_v61 = vshll.u32 %v1741_v6, 16  ;;  %v1253_v24 = vrot.slane %v1252_v17, 4 }
  0x66   : > { %v1239_v34 = vrot.slane %v1238_v27, 4  ;;  %v1402_v39 = vsel %vm1949_vm8, %v1763_v29, %v1401_v30  ;;  %v1271_v26 = vrot.slane %v1269_v62, 5  ;;  %v1744_v27 = vld [vmem:[%s1881_s10 + $0x40] sm:$0xf]  ;;  %v1414_v29 = vsel %vm1949_vm8, %v1766_v22, %v1413_v23  ;;  %v1746_v30 = vld [vmem:[%s1881_s10 + $0x48] sm:$0xf] }
  0x67   : > { %v1427_v46 = vunpack.c.l.b16 %v1402_v39  ;;  %v1257_v25 = vrot.slane %v1255_v61, 5  ;;  %v1274_v50 = vshrl.u32 %v1744_v27, 16  ;;  %v1277_v32 = vshll.u32 %v1744_v27, 16  ;;  %v1792_v39 = vld [vmem:[%s1881_s10 + $0x34] sm:$0xf0] }
  0x68   : > { %v1244_v45 = vsel %vm1955_vm9, %v1239_v34, %v1243_v36  ;;  %v1430_v55 = vunpack.c.l.b16 %v1414_v29  ;;  %v1288_v34 = vshrl.u32 %v1746_v30, 16  ;;  %v1291_v36 = vshll.u32 %v1746_v30, 16  ;;  %v1793_v22 = vld [vmem:[%s1881_s10 + $0x44] sm:$0xf0] }
  0x69   : > { %v1306_v57 = vunpack.c.l.b16 %v1244_v45  ;;  %v1434_v5 = vpack.c.b16 %v1428_v49, %v1427_v46  ;;  %v1258_v31 = vsel %vm1955_vm9, %v1253_v24, %v1257_v25  ;;  %v1276_v42 = vrot.slane %v1274_v50, 4 }
  0x6a   : > { %v1307_v40 = vunpack.c.l.b16 %v1258_v31  ;;  %v1290_v45 = vrot.slane %v1288_v34, 4  ;;  %v1293_v46 = vrot.slane %v1291_v36, 5  ;;  %v1297_v60 = vshll.u32 %v1747_v52, 16 }
  0x6b   : > { %v1312_v11 = vpack.c.b16 %v1306_v57, %v1305_v56  ;;  %v1417_v2 = vrot.slane %v1745_v51, 5  ;;  %v1768_v3 = vrot.slane %v1760_v54, 9 }
  0x6c   : > { %v1294_v59 = vor.u32 %v1293_v46, %v1290_v45 }
  0x6d   : > { %v1418_v13 = vsel %vm1949_vm8, %v1767_v48, %v1417_v2 }
  0x73   : > { %1728 = vmatmul.msk.bf16.vlgmr.msra.gmra.mxu3 %vm257_vm3, %v1715_v14  ;;  %1770 = vmatmul.msk.bf16.vlgmr.msra.gmra.mxu1 %vm257_vm3, %v1433_v16  ;;  %v1032_v14 = vunpack.c.l.b16 %v1019_v8  ;;  %v1033_v16 = vunpack.c.l.b16 %v1023_v9  ;;  %v1295_v8 = vrot.slane %v1294_v59, 4  ;;  %v1299_v9 = vrot.slane %v1297_v60, 5 }
  0x74   : > { %1699 = vmatmul.msk.bf16.vlgmr.msra.gmra.mxu2 %vm257_vm3, %v2069_v38  ;;  %v1260_v38 = vshrl.u32 %v1742_v37, 16  ;;  %v1722_v37 = vld [vmem:[%s1881_s10 + $0x30] sm:$0xf] }
  0x75   : > { %1749 = vmatmul.msk.bf16.vlgmr.msra.gmra.mxu0 %vm257_vm3, %v1311_v21  ;;  %v2164_v19 = vpack.c.b16 %v1033_v16, %v1032_v14  ;;  %v1409_v21 = vrot.slane %v1741_v6, 5  ;;  %v1723_v43 = vor.u32 %v1792_v39, %v1722_v37  ;;  %v1300_v61 = vsel %vm1955_vm9, %v1295_v8, %v1299_v9 }
  0x76   : > { %v1262_v58 = vrot.slane %v1260_v38, 4  ;;  %v1279_v38 = vrot.slane %v1277_v32, 5  ;;  %v1310_v25 = vunpack.c.l.b16 %v1300_v61 }
  0x77   : > { %v1410_v0 = vsel %vm1949_vm8, %v1765_v20, %v1409_v21  ;;  %v1726_v21 = vld [vmem:[%s1881_s10 + $0x40] sm:$0xf] }
  0x78   : > { %v1266_v18 = vor.u32 %v1265_v47, %v1262_v58  ;;  %v1429_v33 = vunpack.c.l.b16 %v1410_v0  ;;  %v1280_v57 = vor.u32 %v1279_v38, %v1276_v42  ;;  %v1283_v47 = vshll.u32 %v1745_v51, 16 }
  0x7a   : > { %v1267_v63 = vrot.slane %v1266_v18, 4  ;;  %v1435_v44 = vpack.c.b16 %v1430_v55, %v1429_v33  ;;  %v1281_v6 = vrot.slane %v1280_v57, 4  ;;  %v1285_v7 = vrot.slane %v1283_v47, 5 }
  0x7b   : > { %v1431_v18 = vunpack.c.l.b16 %v1418_v13 }
  0x7c   : > { %v1286_v17 = vsel %vm1955_vm9, %v1281_v6, %v1285_v7 }
  0x7d   : > { %v1309_v24 = vunpack.c.l.b16 %v1286_v17 }
  0x7f   : > { %v1314_v29 = vpack.c.b16 %v1310_v25, %v1309_v24 }
  0x83   : > { %1729 = vmatmul.msk.bf16.gmra.mxu3 %vm257_vm3, %v1719_v4  ;;  %1771 = vmatmul.msk.bf16.gmra.mxu1 %vm257_vm3, %v1434_v5  ;;  %v1421_v4 = vrot.slane %v1747_v52, 5 }
  0x84   : > { %1700 = vmatmul.msk.bf16.gmra.mxu2 %vm257_vm3, %v2103_v35  ;;  %v1272_v35 = vsel %vm1955_vm9, %v1267_v63, %v1271_v26  ;;  %v1727_v63 = vor.u32 %v1793_v22, %v1726_v21 }
  0x85   : > { %1750 = vmatmul.msk.bf16.gmra.mxu0 %vm257_vm3, %v1312_v11  ;;  %v1308_v41 = vunpack.c.l.b16 %v1272_v35  ;;  %v1422_v14 = vsel %vm1949_vm8, %v1768_v3, %v1421_v4 }
  0x86   : > { %v1432_v62 = vunpack.c.l.b16 %v1422_v14 }
  0x87   : > { %v1313_v56 = vpack.c.b16 %v1308_v41, %v1307_v40 }
  0x88   : > { %v1436_v10 = vpack.c.b16 %v1432_v62, %v1431_v18 }
  0x90   : > { %v349_v49 = vpop.f32.mrf.mxu1 }
  0x92   : > { %v283_v58 = vpop.f32.mrf.mxu0 }
  0x93   : > { %1730 = vmatmul.msk.bf16.gmra.mxu3 %vm257_vm3, %v1723_v43  ;;  %1772 = vmatmul.msk.bf16.gmra.mxu1 %vm257_vm3, %v1435_v44  ;;  %v2187_v1 = vadd.f32 %v349_v49, %v283_v58 }
  0x94   : > { %1701 = vmatmul.msk.bf16.gmra.mxu2 %vm257_vm3, %v2133_v28 }
  0x95   : > { %1751 = vmatmul.msk.bf16.gmra.mxu0 %vm257_vm3, %v1313_v56 }
  0x96   : > { %v359_v5 = vpop.f32.mrf.mxu3 }
  0x97   : > { %v293_v11 = vpop.f32.mrf.mxu2 }
  0x98   : > { %v351_v12 = vpop.f32.mrf.mxu1  ;;  %v2196_v16 = vadd.f32 %v359_v5, %v293_v11 }
  0x9a   : > { %v285_v28 = vpop.f32.mrf.mxu0 }
  0x9b   : > { %v352_v20 = vadd.f32 %v351_v12, %v285_v28 }
  0x9e   : > { %v361_v23 = vpop.f32.mrf.mxu3 }
  0x9f   : > { %v295_v26 = vpop.f32.mrf.mxu2 }
  0xa0   : > { %v354_v27 = vpop.f32.mrf.mxu1  ;;  %v2204_v0 = vadd.f32 %v361_v23, %v295_v26 }
  0xa2   : > { %v288_v30 = vpop.f32.mrf.mxu0 }
  0xa3   : > { %1731 = vmatmul.msk.bf16.gmra.mxu3 %vm257_vm3, %v1727_v63  ;;  %1773 = vmatmul.msk.bf16.gmra.mxu1 %vm257_vm3, %v1436_v10  ;;  %v355_v15 = vadd.f32 %v354_v27, %v288_v30 }
  0xa4   : > { %1702 = vmatmul.msk.bf16.gmra.mxu2 %vm257_vm3, %v2164_v19 }
  0xa5   : > { %1752 = vmatmul.msk.bf16.gmra.mxu0 %vm257_vm3, %v1314_v29 }
  0xa6   : > { %v364_v31 = vpop.f32.mrf.mxu3 }
  0xa7   : > { %v298_v35 = vpop.f32.mrf.mxu2 }
  0xa8   : > { %v356_v50 = vpop.f32.mrf.mxu1  ;;  %v2211_v32 = vadd.f32 %v364_v31, %v298_v35 }
  0xaa   : > { %v290_v33 = vpop.f32.mrf.mxu0 }
  0xab   : > { %v357_v55 = vadd.f32 %v356_v50, %v290_v33 }
  0xae   : > { %v366_v34 = vpop.f32.mrf.mxu3 }
  0xaf   : > { %v300_v36 = vpop.f32.mrf.mxu2 }
  0xb0   : > { %v940_v37 = vpop.f32.mrf.mxu1  ;;  %v2213_v39 = vadd.f32 %v366_v34, %v300_v36 }
  0xb2   : > { %v746_v40 = vpop.f32.mrf.mxu0 }
  0xb6   : > { %v663_v41 = vpop.f32.mrf.mxu3 }
  0xb7   : > { %v538_v42 = vpop.f32.mrf.mxu2 }
  0xb8   : > { %v942_v38 = vpop.f32.mrf.mxu1  ;;  %v558_v9 = vadd.f32 %v538_v42, %v2187_v1 }
  0xba   : > { %v748_v43 = vpop.f32.mrf.mxu0  ;;  %v683_v13 = vadd.f32 %v663_v41, %v558_v9 }
  0xbc   : > { %v766_v18 = vadd.f32 %v746_v40, %v683_v13 }
  0xbe   : > { %v665_v19 = vpop.f32.mrf.mxu3  ;;  %v960_v22 = vadd.f32 %v940_v37, %v766_v18 }
  0xbf   : > { %v540_v44 = vpop.f32.mrf.mxu2 }
  0xc0   : > { %v945_v45 = vpop.f32.mrf.mxu1  ;;  %v559_v17 = vadd.f32 %v540_v44, %v352_v20 }
  0xc2   : > { %v751_v46 = vpop.f32.mrf.mxu0  ;;  %v684_v21 = vadd.f32 %v665_v19, %v559_v17 }
  0xc4   : > { %v767_v26 = vadd.f32 %v748_v43, %v684_v21 }
  0xc6   : > { %v668_v49 = vpop.f32.mrf.mxu3  ;;  %v961_v31 = vadd.f32 %v942_v38, %v767_v26 }
  0xc7   : > { %v543_v51 = vpop.f32.mrf.mxu2 }
  0xc8   : > { %v2215_v52 = vpop.f32.mrf.mxu1  ;;  %v560_v63 = vadd.f32 %v543_v51, %v355_v15 }
  0xca   : > { %v753_v53 = vpop.f32.mrf.mxu0  ;;  %v685_v29 = vadd.f32 %v668_v49, %v560_v63 }
  0xcc   : > { %v768_v36 = vadd.f32 %v751_v46, %v685_v29 }
  0xce   : > { %v670_v54 = vpop.f32.mrf.mxu3  ;;  %v962_v19 = vadd.f32 %v945_v45, %v768_v36 }
  0xcf   : > { %v545_v56 = vpop.f32.mrf.mxu2 }
  0xd0   : > { %v2217_v57 = vpop.f32.mrf.mxu1  ;;  %v561_v50 = vadd.f32 %v545_v56, %v357_v55 }
  0xd2   : > { %v2219_v58 = vpop.f32.mrf.mxu0  ;;  %v686_v42 = vadd.f32 %v670_v54, %v561_v50 }
  0xd4   : > { %v769_v9 = vadd.f32 %v753_v53, %v686_v42 }
  0xd6   : > { %v673_v47 = vpop.f32.mrf.mxu3  ;;  %v963_v54 = vadd.f32 %v2215_v52, %v769_v9 }
  0xd7   : > { %v548_v59 = vpop.f32.mrf.mxu2 }
  0xd8   : > { %v2221_v60 = vpop.f32.mrf.mxu1  ;;  %v562_v38 = vadd.f32 %v548_v59, %v2196_v16 }
  0xda   : > { %v2223_v48 = vpop.f32.mrf.mxu0  ;;  %v687_v46 = vadd.f32 %v673_v47, %v562_v38 }
  0xdc   : > { %v770_v16 = vadd.f32 %v2219_v58, %v687_v46 }
  0xde   : > { %v2225_v2 = vpop.f32.mrf.mxu3  ;;  %v964_v47 = vadd.f32 %v2217_v57, %v770_v16 }
  0xdf   : > { %v550_v3 = vpop.f32.mrf.mxu2 }
  0xe0   : > { %v2227_v4 = vpop.f32.mrf.mxu1  ;;  %v563_v18 = vadd.f32 %v550_v3, %v2204_v0 }
  0xe2   : > { %v2229_v5 = vpop.f32.mrf.mxu0 }
  0xe6   : > { %v2231_v6 = vpop.f32.mrf.mxu3 }
  0xe7   : > { %v2233_v7 = vpop.f32.mrf.mxu2 }
  0xe8   : > { %v2235_v8 = vpop.f32.mrf.mxu1  ;;  %v564_v0 = vadd.f32 %v2233_v7, %v2211_v32 }
  0xea   : > { %v2238_v11 = vpop.f32.mrf.mxu0 }
  0xee   : > { %v2240_v12 = vpop.f32.mrf.mxu3 }
  0xef   : > { %v2242_v14 = vpop.f32.mrf.mxu2 }
  0xf0   : > { %v1461_v28 = vpop.f32.mrf.mxu1  ;;  %v565_v32 = vadd.f32 %v2242_v14, %v2213_v39 }
  0xf2   : > { %v1339_v61 = vpop.f32.mrf.mxu0 }
  0xf6   : > { %v1145_v62 = vpop.f32.mrf.mxu3 }
  0xf7   : > { %v1062_v23 = vpop.f32.mrf.mxu2 }
  0xf8   : > { %v1082_v24 = vadd.f32 %v1062_v23, %v960_v22  ;;  %v1463_v25 = vpop.f32.mrf.mxu1  ;;  %v688_v22 = vadd.f32 %v2225_v2, %v563_v18 }
  0xfa   : > { %v1165_v1 = vadd.f32 %v1145_v62, %v1082_v24  ;;  %v1341_v10 = vpop.f32.mrf.mxu0  ;;  %v771_v58 = vadd.f32 %v2223_v48, %v688_v22 }
  0xfc   : > { %v1359_v27 = vadd.f32 %v1339_v61, %v1165_v1  ;;  %v965_v26 = vadd.f32 %v2221_v60, %v771_v58 }
  0xfe   : > { %v1147_v20 = vpop.f32.mrf.mxu3  ;;  %v1481_v30 = vadd.f32 %v1461_v28, %v1359_v27 }
  0xff   : > { %v1064_v35 = vpop.f32.mrf.mxu2 }
 0x100   : > { %1489 = vst.msk [vmem:[%s2248_s24] sm:$0xff] %vm257_vm3, %v1481_v30  ;;  %v1083_v15 = vadd.f32 %v1064_v35, %v961_v31  ;;  %v1466_v37 = vpop.f32.mrf.mxu1 }
 0x102   : > { %v1166_v33 = vadd.f32 %v1147_v20, %v1083_v15  ;;  %v1344_v34 = vpop.f32.mrf.mxu0 }
 0x104   : > { %v1360_v40 = vadd.f32 %v1341_v10, %v1166_v33  ;;  %v689_v10 = vadd.f32 %v2231_v6, %v564_v0  ;;  %v690_v6 = vadd.f32 %v2240_v12, %v565_v32 }
 0x106   : > { %v1150_v41 = vpop.f32.mrf.mxu3  ;;  %v1482_v43 = vadd.f32 %v1463_v25, %v1360_v40  ;;  %v772_v48 = vadd.f32 %v2229_v5, %v689_v10  ;;  %v773_v39 = vadd.f32 %v2238_v11, %v690_v6 }
 0x107   : > { %v1067_v44 = vpop.f32.mrf.mxu2 }
 0x108   : > { %1490 = vst.msk [vmem:[%s2248_s24 + $0x8] sm:$0xff] %vm257_vm3, %v1482_v43  ;;  %v1084_v49 = vadd.f32 %v1067_v44, %v962_v19  ;;  %v1468_v56 = vpop.f32.mrf.mxu1  ;;  %v966_v35 = vadd.f32 %v2227_v4, %v772_v48 }
 0x10a   : > { %v1167_v51 = vadd.f32 %v1150_v41, %v1084_v49  ;;  %v1346_v13 = vpop.f32.mrf.mxu0 }
 0x10c   : > { %v1361_v55 = vadd.f32 %v1344_v34, %v1167_v51 }
 0x10e   : > { %v1152_v28 = vpop.f32.mrf.mxu3  ;;  %v1483_v17 = vadd.f32 %v1466_v37, %v1361_v55  ;;  %v967_v37 = vadd.f32 %v2235_v8, %v773_v39 }
 0x10f   : > { %v1069_v61 = vpop.f32.mrf.mxu2 }
 0x110   : > { %1491 = vst.msk [vmem:[%s2248_s24 + $0x10] sm:$0xff] %vm257_vm3, %v1483_v17  ;;  %v1085_v45 = vadd.f32 %v1069_v61, %v963_v54  ;;  %v1471_v24 = vpop.f32.mrf.mxu1 }
 0x112   : > { %v1168_v62 = vadd.f32 %v1152_v28, %v1085_v45  ;;  %v1349_v53 = vpop.f32.mrf.mxu0 }
 0x114   : > { %v1362_v59 = vadd.f32 %v1346_v13, %v1168_v62 }
 0x116   : > { %v1155_v21 = vpop.f32.mrf.mxu3  ;;  %v1484_v23 = vadd.f32 %v1468_v56, %v1362_v59 }
 0x117   : > { %v1072_v52 = vpop.f32.mrf.mxu2 }
 0x118   : > { %1492 = vst.msk [vmem:[%s2248_s24 + $0x18] sm:$0xff] %vm257_vm3, %v1484_v23  ;;  %v1086_v25 = vadd.f32 %v1072_v52, %v964_v47  ;;  %v1473_v29 = vpop.f32.mrf.mxu1 }
 0x11a   : > { %v1169_v3 = vadd.f32 %v1155_v21, %v1086_v25  ;;  %v1351_v57 = vpop.f32.mrf.mxu0 }
 0x11c   : > { %v1363_v63 = vadd.f32 %v1349_v53, %v1169_v3 }
 0x11e   : > { %v1157_v1 = vpop.f32.mrf.mxu3  ;;  %v1485_v2 = vadd.f32 %v1471_v24, %v1363_v63 }
 0x11f   : > { %v1074_v27 = vpop.f32.mrf.mxu2 }
 0x120   : > { %1493 = vst.msk [vmem:[%s2248_s24 + $0x20] sm:$0xff] %vm257_vm3, %v1485_v2  ;;  %v1087_v20 = vadd.f32 %v1074_v27, %v965_v26  ;;  %v1476_v14 = vpop.f32.mrf.mxu1 }
 0x122   : > { %v1170_v7 = vadd.f32 %v1157_v1, %v1087_v20  ;;  %v1354_v33 = vpop.f32.mrf.mxu0 }
 0x124   : > { %v1364_v30 = vadd.f32 %v1351_v57, %v1170_v7 }
 0x126   : > { %v1486_v31 = vadd.f32 %v1473_v29, %v1364_v30  ;;  %v1160_v60 = vpop.f32.mrf.mxu3 }
 0x127   : > { %v1077_v15 = vpop.f32.mrf.mxu2 }
 0x128   : > { %1494 = vst.msk [vmem:[%s2248_s24 + $0x28] sm:$0xff] %vm257_vm3, %v1486_v31  ;;  %v1088_v50 = vadd.f32 %v1077_v15, %v966_v35  ;;  %v1478_v19 = vpop.f32.mrf.mxu1 }
 0x12a   : > { %v1171_v34 = vadd.f32 %v1160_v60, %v1088_v50  ;;  %v1356_v42 = vpop.f32.mrf.mxu0 }
 0x12c   : > { %v1365_v36 = vadd.f32 %v1354_v33, %v1171_v34 }
 0x12e   : > { %v1487_v5 = vadd.f32 %v1476_v14, %v1365_v36  ;;  %v1162_v4 = vpop.f32.mrf.mxu3 }
 0x12f   : > { %v1079_v40 = vpop.f32.mrf.mxu2 }
 0x130   : > { %1495 = vst.msk [vmem:[%s2248_s24 + $0x30] sm:$0xff] %vm257_vm3, %v1487_v5  ;;  %v1089_v12 = vadd.f32 %v1079_v40, %v967_v37 }
 0x132   : > { %v1172_v41 = vadd.f32 %v1162_v4, %v1089_v12 }
 0x134   : > { %v1366_v43 = vadd.f32 %v1356_v42, %v1172_v41 }
 0x136   : > { %v1488_v44 = vadd.f32 %v1478_v19, %v1366_v43 }
 0x138   : > { %1496 = vst.msk [vmem:[%s2248_s24 + $0x38] sm:$0xff] %vm257_vm3, %v1488_v44 }
 0x139 PF: > { %s14_s15 = sadd.s32 1, %s1811_s15  }
 0x13a   : > { %p11_p4 = scmp.ge.s32.totalorder %s14_s15, 4  }
 0x13c   :  { %13 = sbr.rel (!%p11_p4) target bundleno = 1 (0x1), region = 79 }

</bundles_post_ra>
